<compile_context>
chip_gen: v7x
topology: tpu7x:2x2x1
jax: 0.10.0
libtpu: 0.0.40
codegen_flags: <defaults>
</compile_context>

<pallas_src>
import jax
import jax.numpy as jnp
from jax import lax
from jax.experimental import pallas as pl
from jax.experimental.pallas import tpu as pltpu


def _resident_spec(block_shape, index_map):
    """BlockSpec for grid-invariant operands: single-buffered (Buffered(1)).

    Falls back to a default (double-buffered) spec on jax versions without
    BlockSpec(pipeline_mode=...)."""
    try:
        return pl.BlockSpec(block_shape, index_map, pipeline_mode=pl.Buffered(1))
    except (AttributeError, TypeError):
        return pl.BlockSpec(block_shape, index_map)


def _text_adapter_kernel(scal_ref,   # SMEM (1,) f32 -- [r_txt]
                         txt_ref,    # VMEM (tn, D) bf16 -- caption-c text rows
                         wt_ref,     # VMEM (D, D) bf16  -- text adapter weight
                         bt_ref,     # VMEM (1, D) f32   -- text adapter bias
                         out_ref):   # VMEM (D, tn) bf16 -- adapted+normed, transposed
    r_t = scal_ref[0]
    txt_bf = txt_ref[...]                                        # bf16, MXU operand
    adapt = jnp.dot(txt_bf, wt_ref[...],
                    preferred_element_type=jnp.float32) + bt_ref[...]
    mixed = r_t * txt_bf.astype(jnp.float32) + (1.0 - r_t) * adapt
    # L2 row-norm via rsqrt (EUP slot).  No epsilon, matching torch x / x.norm().
    inv = lax.rsqrt(jnp.sum(mixed * mixed, axis=1, keepdims=True))
    # Transpose once here (per forward) so the main kernel never transposes.
    out_ref[...] = (mixed * inv).T.astype(jnp.bfloat16)


def _image_logits_kernel(scal_ref,   # SMEM (2,) f32 -- [r_img, exp(logit_scale)]
                         img_ref,    # VMEM (tm, D) bf16 -- image feature row tile
                         wi_ref,     # VMEM (D, D) bf16  -- image adapter weight (resident)
                         bi_ref,     # VMEM (1, D) f32   -- image adapter bias   (resident)
                         txt_t_ref,  # VMEM (D, B) bf16  -- adapted+normed text  (resident)
                         out_ref):   # VMEM (tm, B) f32  -- logits tile
    r_i = scal_ref[0]
    scale = scal_ref[1]                                          # exp(logit_scale), precomputed
    img_bf = img_ref[...]                                        # bf16, MXU operand
    adapt = jnp.dot(img_bf, wi_ref[...],
                    preferred_element_type=jnp.float32) + bi_ref[...]
    mixed = r_i * img_bf.astype(jnp.float32) + (1.0 - r_i) * adapt
    inv = lax.rsqrt(jnp.sum(mixed * mixed, axis=1, keepdims=True))
    # Fold the logit scale into the (tm, D) tensor (scalar*(tm,1), then (tm,D))
    # instead of multiplying the (tm, B) similarity output.
    img_n = mixed * (inv * scale)
    out_ref[...] = jnp.dot(img_n.astype(jnp.bfloat16), txt_t_ref[...],
                           preferred_element_type=jnp.float32)


def contrastive_residual_adapter_forward(image_feats, text_feats_all, caption_idx,
                                         params, *, tile_m=None, text_tile=None):
    """image_feats: (B, D); text_feats_all: (B, C, D); caption_idx: int.

    Returns the (B, B) contrastive logits with the same semantics as the torch
    forward (the random caption index is made explicit for determinism).
    """
    B, D = image_feats.shape
    assert text_feats_all.shape[0] == B and text_feats_all.shape[2] == D
    assert B % 128 == 0, "batch must be a multiple of 128 (lane-dense logits)"
    assert D % 8 == 0

    # Caption selection in the wrapper: one contiguous (B, D) slab instead of a
    # strided in-kernel DMA on the first-step critical path.
    txt_c = text_feats_all[:, caption_idx, :]

    # bf16 features: half the HBM->VMEM bytes; matmul operands are bf16 anyway.
    img_bf = image_feats.astype(jnp.bfloat16)
    txt_bf = txt_c.astype(jnp.bfloat16)
    w_img = params["W_img"].astype(jnp.bfloat16)
    w_txt = params["W_txt"].astype(jnp.bfloat16)
    b_img = params["b_img"].astype(jnp.float32).reshape(1, D)
    b_txt = params["b_txt"].astype(jnp.float32).reshape(1, D)

    r_img = jnp.asarray(params["r_img"], jnp.float32)
    r_txt = jnp.asarray(params["r_txt"], jnp.float32)
    exp_scale = jnp.exp(jnp.asarray(params["logit_scale"], jnp.float32))
    scal_txt = jnp.reshape(r_txt, (1,))
    scal_img = jnp.stack([r_img, exp_scale])

    # ---------- Pass 1: text adapter + norm (runs once, not per image tile) ----------
    if text_tile is None:
        text_tile = B if B <= 1024 else 512
    tn = min(text_tile, B)
    assert B % tn == 0 and tn % 128 == 0
    # TODO(synk): for very large B tile the (D, B) text slab along columns in
    #             pass 2 as well (second grid axis) to stay within v7x's 64 MiB.

    txt_t = pl.pallas_call(
        _text_adapter_kernel,
        out_shape=jax.ShapeDtypeStruct((D, B), jnp.bfloat16),
        grid_spec=pltpu.PrefetchScalarGridSpec(
            num_scalar_prefetch=0,
            grid=(B // tn,),
            in_specs=[
                pl.BlockSpec(memory_space=pltpu.SMEM),           # [r_txt]
                pl.BlockSpec((tn, D), lambda i: (i, 0)),         # text row tile
                _resident_spec((D, D), lambda i: (0, 0)),        # W_txt (resident)
                _resident_spec((1, D), lambda i: (0, 0)),        # b_txt (resident)
            ],
            out_specs=pl.BlockSpec((D, tn), lambda i: (0, i)),   # transposed, lane-dense
        ),
        compiler_params=pltpu.CompilerParams(
            dimension_semantics=("parallel",)),
    )(scal_txt, txt_bf, w_txt, b_txt)

    # ---------- Pass 2: image adapter + norm + scaled similarity ----------
    # Default: grid of 2 row-tiles when B >= 256 so both v7x TensorCores get
    # work; on single-TC v5e/v6e callers may pass tile_m=B for grid=1.
    if tile_m is None:
        tile_m = B if B <= 128 else max(128, B // 2)
    tm = min(tile_m, B)
    assert B % tm == 0 and tm % 8 == 0

    # Rough VMEM budget (img tile double-buffered, out tile double-buffered,
    # single-buffered residents); raise the scoped limit only when needed.
    main_vmem = (2 * tm * D * 2 + 2 * tm * B * 4
                 + D * D * 2 + D * 4 + D * B * 2)
    vmem_limit = None if main_vmem < (12 << 20) else int(main_vmem * 3 // 2)

    return pl.pallas_call(
        _image_logits_kernel,
        out_shape=jax.ShapeDtypeStruct((B, B), jnp.float32),
        grid_spec=pltpu.PrefetchScalarGridSpec(
            num_scalar_prefetch=0,
            grid=(B // tm,),
            in_specs=[
                pl.BlockSpec(memory_space=pltpu.SMEM),           # [r_img, exp(scale)]
                pl.BlockSpec((tm, D), lambda i: (i, 0)),         # image row tile
                _resident_spec((D, D), lambda i: (0, 0)),        # W_img (resident)
                _resident_spec((1, D), lambda i: (0, 0)),        # b_img (resident)
                _resident_spec((D, B), lambda i: (0, 0)),        # adapted text (resident)
            ],
            out_specs=pl.BlockSpec((tm, B), lambda i: (i, 0)),   # lane-dense logits tile
        ),
        compiler_params=pltpu.CompilerParams(
            dimension_semantics=("parallel",),
            vmem_limit_bytes=vmem_limit),
    )(scal_img, img_bf, w_img, b_img, txt_t)


if __name__ == "__main__":
    # MXU/lane-friendly small shapes: B=256 (two 128-row tiles), C=5 captions,
    # hidden D=256.
    B, C, D = 256, 5, 256

    key = jax.random.PRNGKey(0)
    k_img, k_txt, k_wi, k_bi, k_wt, k_bt = jax.random.split(key, 6)

    image_feats = jax.random.normal(k_img, (B, 1, D), dtype=jnp.float32)  # batch[0]
    text_feats = jax.random.normal(k_txt, (B, C, D), dtype=jnp.float32)   # batch[1]

    params = {
        "W_img": 0.02 * jax.random.normal(k_wi, (D, D), dtype=jnp.float32),
        "b_img": 0.01 * jax.random.normal(k_bi, (D,), dtype=jnp.float32),
        "W_txt": 0.02 * jax.random.normal(k_wt, (D, D), dtype=jnp.float32),
        "b_txt": 0.01 * jax.random.normal(k_bt, (D,), dtype=jnp.float32),
        "r_img": 0.6,                                  # initial_residual_ratio
        "r_txt": 0.6,
        "logit_scale": float(jnp.log(1.0 / 0.07)),     # initial_logit_scale (CLIP)
    }

    # Mirrors `batch[0].squeeze()`; the random caption choice is made explicit.
    img_squeezed = jnp.squeeze(image_feats, axis=1)    # (B, D)
    caption_idx = 2                                    # stands in for random.randint(0, C-1)

    logits = contrastive_residual_adapter_forward(
        img_squeezed, text_feats, caption_idx, params)
    logits = jax.block_until_ready(logits)

    # Pure-JAX reference mirroring the bf16-operand / f32-accumulation contract.
    def ref(img, txt_all, c, p):
        txtc = txt_all[:, c, :]
        img_b = img.astype(jnp.bfloat16)
        txt_b = txtc.astype(jnp.bfloat16)
        ia = jnp.dot(img_b, p["W_img"].astype(jnp.bfloat16),
                     preferred_element_type=jnp.float32) + p["b_img"]
        ta = jnp.dot(txt_b, p["W_txt"].astype(jnp.bfloat16),
                     preferred_element_type=jnp.float32) + p["b_txt"]
        ia = p["r_img"] * img_b.astype(jnp.float32) + (1 - p["r_img"]) * ia
        ta = p["r_txt"] * txt_b.astype(jnp.float32) + (1 - p["r_txt"]) * ta
        ia = ia / jnp.linalg.norm(ia, axis=1, keepdims=True)
        ta = ta / jnp.linalg.norm(ta, axis=1, keepdims=True)
        sim = jnp.dot(ia.astype(jnp.bfloat16), ta.astype(jnp.bfloat16).T,
                      preferred_element_type=jnp.float32)
        return sim * jnp.exp(p["logit_scale"])

    expected = ref(img_squeezed, text_feats, caption_idx, params)
    assert logits.shape == (B, B)
    assert jnp.allclose(logits, expected, atol=1e-1, rtol=5e-2), (
        float(jnp.max(jnp.abs(logits - expected))))

    print("KERNEL_OK")
</pallas_src>

<mosaic_0001>
module attributes {stable_mosaic.version = 11 : i64} {
  func.func @_text_adapter_kernel(%arg0: i32, %arg1: memref<1xf32, #tpu.memory_space<smem>>, %arg2: memref<256x256xbf16, #tpu.memory_space<vmem>>, %arg3: memref<256x256xbf16, #tpu.memory_space<vmem>>, %arg4: memref<1x256xf32, #tpu.memory_space<vmem>>, %arg5: memref<256x256xbf16, #tpu.memory_space<vmem>>) attributes {dimension_semantics = [#tpu.dimension_semantics<parallel>], iteration_bounds = array<i64: 1>, scalar_prefetch = 0 : i64, scratch_operands = 0 : i64, tpu.core_type = #tpu.core_type<tc>, window_params = [{transform_indices = @transform_0, window_bounds = array<i64: 1>}, {transform_indices = @transform_1, window_bounds = array<i64: 256, 256>}, {pipeline_mode = #tpu.pipeline_mode<synchronous>, transform_indices = @transform_2, window_bounds = array<i64: 256, 256>}, {pipeline_mode = #tpu.pipeline_mode<synchronous>, transform_indices = @transform_3, window_bounds = array<i64: 1, 256>}, {transform_indices = @transform_4, window_bounds = array<i64: 256, 256>}]} {
    %c0 = arith.constant 0 : index
    %0 = memref.load %arg1[%c0] : memref<1xf32, #tpu.memory_space<smem>>
    %c0_0 = arith.constant 0 : index
    %c0_1 = arith.constant 0 : index
    %1 = vector.load %arg2[%c0_0, %c0_1] : memref<256x256xbf16, #tpu.memory_space<vmem>>, vector<256x256xbf16>
    %c0_2 = arith.constant 0 : index
    %c0_3 = arith.constant 0 : index
    %2 = vector.load %arg3[%c0_2, %c0_3] : memref<256x256xbf16, #tpu.memory_space<vmem>>, vector<256x256xbf16>
    %cst = arith.constant dense<0.000000e+00> : vector<256x256xf32>
    %3 = tpu.matmul %1, %2, %cst {dimension_numbers = #tpu.dot_dimension_numbers<[1], [0], [0], [1], [0, 0, 1, 1], [], []>} : vector<256x256xbf16>, vector<256x256xbf16>, vector<256x256xf32> -> vector<256x256xf32>
    %c0_4 = arith.constant 0 : index
    %c0_5 = arith.constant 0 : index
    %4 = vector.load %arg4[%c0_4, %c0_5] : memref<1x256xf32, #tpu.memory_space<vmem>>, vector<1x256xf32>
    %5 = vector.broadcast %4 : vector<1x256xf32> to vector<256x256xf32>
    %6 = arith.addf %3, %5 : vector<256x256xf32>
    %7 = arith.extf %1 : vector<256x256xbf16> to vector<256x256xf32>
    %8 = vector.broadcast %0 : f32 to vector<256x256xf32>
    %9 = arith.mulf %8, %7 : vector<256x256xf32>
    %cst_6 = arith.constant 1.000000e+00 : f32
    %10 = arith.subf %cst_6, %0 : f32
    %11 = vector.broadcast %10 : f32 to vector<256x256xf32>
    %12 = arith.mulf %11, %6 : vector<256x256xf32>
    %13 = arith.addf %9, %12 : vector<256x256xf32>
    %14 = arith.mulf %13, %13 : vector<256x256xf32>
    %cst_7 = arith.constant dense<0.000000e+00> : vector<256xf32>
    %15 = vector.multi_reduction <add>, %14, %cst_7 [1] : vector<256x256xf32> to vector<256xf32>
    %16 = vector.shape_cast %15 : vector<256xf32> to vector<256x1xf32>
    %17 = math.rsqrt %16 : vector<256x1xf32>
    %18 = vector.broadcast %17 : vector<256x1xf32> to vector<256x256xf32>
    %19 = arith.mulf %13, %18 : vector<256x256xf32>
    %20 = tpu.transpose %19, [1, 0] : vector<256x256xf32> -> vector<256x256xf32>
    %21 = arith.truncf %20 : vector<256x256xf32> to vector<256x256xbf16>
    %c0_8 = arith.constant 0 : index
    %c0_9 = arith.constant 0 : index
    %22 = vector.load %arg5[%c0_8, %c0_9] : memref<256x256xbf16, #tpu.memory_space<vmem>>, vector<256x256xbf16>
    tpu.vector_store %arg5[%c0_8, %c0_9], %21 {strides = array<i32>} : memref<256x256xbf16, #tpu.memory_space<vmem>>, vector<256x256xbf16>,
    return
  }
  func.func @transform_0(%arg0: i32) -> i32 {
    %c0_i32 = arith.constant 0 : i32
    %c0_i32_0 = arith.constant 0 : i32
    return %c0_i32 : i32
  }
  func.func @transform_1(%arg0: i32) -> (i32, i32) {
    %c0_i32 = arith.constant 0 : i32
    %c0_i32_0 = arith.constant 0 : i32
    return %arg0, %c0_i32 : i32, i32
  }
  func.func @transform_2(%arg0: i32) -> (i32, i32) {
    %c0_i32 = arith.constant 0 : i32
    %c0_i32_0 = arith.constant 0 : i32
    %c0_i32_1 = arith.constant 0 : i32
    return %c0_i32, %c0_i32_0 : i32, i32
  }
  func.func @transform_3(%arg0: i32) -> (i32, i32) {
    %c0_i32 = arith.constant 0 : i32
    %c0_i32_0 = arith.constant 0 : i32
    %c0_i32_1 = arith.constant 0 : i32
    return %c0_i32, %c0_i32_0 : i32, i32
  }
  func.func @transform_4(%arg0: i32) -> (i32, i32) {
    %c0_i32 = arith.constant 0 : i32
    %c0_i32_0 = arith.constant 0 : i32
    return %c0_i32, %arg0 : i32, i32
  }
}

</mosaic_0001>

<bundles_post_ra>
// kernel: tpu_custom_call.1
= control target key start
LH: loop header
LB: loop body
LE: loop exit
PB: predicated region body
PF: predicated region fallthrough
CT: control target
= control target key end

     0   :  { %10 = vsyncpa [#allocation4], 0  ;;  %s3111_s0 = inlined_call_operand.<no memory space> [shape: f32[1], index: 0, kind: input, shape index: {}]   ;;  %s3112_s1 = inlined_call_operand.hbm [shape: bf16[256,256], index: 1, kind: input, shape index: {}]   ;;  %s3113_s2 = inlined_call_operand.hbm [shape: bf16[256,256], index: 2, kind: input, shape index: {}]   ;;  %s3114_s3 = inlined_call_operand.vmem [shape: f32[1,256], index: 3, kind: input, shape index: {}]   ;;  %s3115_s4 = inlined_call_operand.hbm [shape: bf16[256,256], index: 4, kind: output, shape index: {}]  }
   0x1   :  { %11 = vsyncpa [#allocation7], 0 }
   0x2   :  { %12 = vsyncpa [#allocation5], 0  ;;  %s2127_s15 = smov [#allocation3]   ;;  %s2055_s19 = scalar_lea.hbm %s3112_s1, 4096 }
   0x3   :  { %s20_s16 = sshll.u32 %s2127_s15, 4  ;;  %p2056_p0 = scmp.ne.s32.totalorder %s3112_s1, %s2055_s19  ;;  %s21_s16 = int_to_ptr.vmem [resolvable:$true] %s20_s16 }
   0x4   :  { %p2059_p1 = scmp.lt.u32.totalorder %s2055_s19, %s3112_s1 }
   0x6   :  { %p2061_p2 = pnand %p2059_p1, %p2056_p0 }
   0x8   :  { %2064 = shalt.err (!%p2061_p2)
}
   0x9   :  { %s2065_s24 = scalar_lea.vmem %s21_s16, 4096  ;;  %p2070_p4 = scmp.lt.s32.totalorder %s21_s16, %s21_s16 }
   0xa   :  { %p2066_p3 = scmp.ne.s32.totalorder %s21_s16, %s2065_s24  ;;  %p2071_p5 = scmp.lt.s32.totalorder %s2065_s24, %s2065_s24 }
   0xc   :  { %p2072_p6 = por %p2071_p5, %p2070_p4 }
   0xe   :  { %p2073_p7 = pnand %p2072_p6, %p2066_p3 }
  0x10   :  { %2076 = shalt.err (!%p2073_p7)
}
  0x11   :  { %s2128_s25 = smov 128   ;;  %s2129_s26 = smov 8  }
  0x12   :  { %26 = dma.hbm_to_vmem [thread:$0]  %s3112_s1, 4096, %s21_s16, [#allocation4], %s2128_s25, %s2128_s25, %s2129_s26  }
  0x13   :  { %s2130_s29 = smov [#allocation6]   ;;  %s2077_s7 = scalar_lea.hbm %s3113_s2, 4096 }
  0x14   :  { %s32_s30 = sshll.u32 %s2130_s29, 4  ;;  %p2078_p8 = scmp.ne.s32.totalorder %s3113_s2, %s2077_s7  ;;  %s33_s30 = int_to_ptr.vmem [resolvable:$true] %s32_s30 }
  0x15   :  { %p2081_p9 = scmp.lt.u32.totalorder %s2077_s7, %s3113_s2 }
  0x17   :  { %p2083_p10 = pnand %p2081_p9, %p2078_p8 }
  0x19   :  { %2086 = shalt.err (!%p2083_p10)
}
  0x1a   :  { %s2087_s12 = scalar_lea.vmem %s33_s30, 4096  ;;  %p2092_p12 = scmp.lt.s32.totalorder %s33_s30, %s33_s30 }
  0x1b   :  { %p2088_p11 = scmp.ne.s32.totalorder %s33_s30, %s2087_s12  ;;  %p2093_p13 = scmp.lt.s32.totalorder %s2087_s12, %s2087_s12 }
  0x1d   :  { %p2094_p0 = por %p2093_p13, %p2092_p12 }
  0x1f   :  { %p2095_p1 = pnand %p2094_p0, %p2088_p11 }
  0x21   :  { %2098 = shalt.err (!%p2095_p1)
}
  0x22   :  { %38 = dma.hbm_to_vmem [thread:$0]  %s3113_s2, 4096, %s33_s30, [#allocation7], %s2128_s25, %s2128_s25, %s2129_s26  }
  0x23   :  { %2121 = dma.done.wait [#allocation4], 4096  }
  0x24   :  { %2122 = vsyncadd [#allocation4], 4294963200 }
  0x25   :  { %2123 = dma.done.wait [#allocation7], 4096  }
  0x26   :  { %2124 = vsyncadd [#allocation7], 4294963200  ;;  %v1911_v0 = vld [vmem:[#allocation6 + $0x4] ss:$8 sps:$4 sm:$0xff]   ;;  %v1913_v1 = vld [vmem:[#allocation6] ss:$8 sps:$4 sm:$0xff]  }
  0x27   :  { %444 = vmatprep.subr.bf16.mxu0 %v1911_v0  ;;  %1650 = vmatprep.subr.bf16.mxu1 %v1911_v0  ;;  %v1914_v2 = vld [vmem:[#allocation6 + $0x14] ss:$8 sps:$4 sm:$0xff]   ;;  %v1916_v3 = vld [vmem:[#allocation6 + $0x10] ss:$8 sps:$4 sm:$0xff]   ;;  %v1917_v4 = vld [vmem:[#allocation6 + $0x24] ss:$8 sps:$4 sm:$0xff]  }
  0x28   :  { %445 = vmatpush1.bf16.msra.mxu0 %v1913_v1  ;;  %1666 = vmatpush1.bf16.msra.mxu1 %v1913_v1  ;;  %v1919_v5 = vld [vmem:[#allocation6 + $0x20] ss:$8 sps:$4 sm:$0xff]   ;;  %v1920_v6 = vld [vmem:[#allocation6 + $0x34] ss:$8 sps:$4 sm:$0xff]   ;;  %v1922_v7 = vld [vmem:[#allocation6 + $0x30] ss:$8 sps:$4 sm:$0xff]  }
  0x29   :  { %446 = vmatprep.subr.bf16.mxu0 %v1914_v2  ;;  %1651 = vmatprep.subr.bf16.mxu1 %v1914_v2  ;;  %v1923_v8 = vld [vmem:[#allocation6 + $0x44] ss:$8 sps:$4 sm:$0xff]   ;;  %v1925_v9 = vld [vmem:[#allocation6 + $0x40] ss:$8 sps:$4 sm:$0xff]   ;;  %v1926_v10 = vld [vmem:[#allocation6 + $0x54] ss:$8 sps:$4 sm:$0xff]  }
  0x2a   :  { %v1928_v11 = vld [vmem:[#allocation6 + $0x50] ss:$8 sps:$4 sm:$0xff]   ;;  %v1929_v12 = vld [vmem:[#allocation6 + $0x64] ss:$8 sps:$4 sm:$0xff]   ;;  %v1931_v18 = vld [vmem:[#allocation6 + $0x60] ss:$8 sps:$4 sm:$0xff]  }
  0x2b   :  { %v2187_v13 = vld [vmem:[#allocation3] sm:$0xff]  ;;  %v2189_v14 = vld [vmem:[#allocation3 + $0x8] sm:$0xff]  ;;  %v1932_v20 = vld [vmem:[#allocation6 + $0x74] ss:$8 sps:$4 sm:$0xff]   ;;  %s766_s15 = ssub.f32 1.0, %s3111_s0 }
  0x2c   :  { %447 = vmatpush1.bf16.msra.mxu0 %v1916_v3  ;;  %1667 = vmatpush1.bf16.msra.mxu1 %v1916_v3  ;;  %v1523_v15 = vcombine.high %v2187_v13, %v2189_v14  ;;  %v2193_v16 = vld [vmem:[#allocation3 + $0x80] sm:$0xff]  ;;  %v2195_v17 = vld [vmem:[#allocation3 + $0x88] sm:$0xff]  ;;  %v1934_v21 = vld [vmem:[#allocation6 + $0x70] ss:$8 sps:$4 sm:$0xff]   ;;  %v1522_v42 = vcombine.low %v2187_v13, %v2189_v14 }
  0x2d   :  { %448 = vmatprep.subr.bf16.mxu0 %v1917_v4  ;;  %1652 = vmatprep.subr.bf16.mxu1 %v1917_v4  ;;  %v1539_v19 = vcombine.high %v2193_v16, %v2195_v17  ;;  %v1935_v22 = vld [vmem:[#allocation6 + $0x84] ss:$8 sps:$4 sm:$0xff]   ;;  %v1937_v23 = vld [vmem:[#allocation6 + $0x80] ss:$8 sps:$4 sm:$0xff]   ;;  %v1938_v24 = vld [vmem:[#allocation6 + $0x94] ss:$8 sps:$4 sm:$0xff]   ;;  %v1538_v43 = vcombine.low %v2193_v16, %v2195_v17 }
  0x2e   :  { %476 = vmatprep.mubr.bf16.mxu0 %v1523_v15  ;;  %v1940_v25 = vld [vmem:[#allocation6 + $0x90] ss:$8 sps:$4 sm:$0xff]   ;;  %v1941_v26 = vld [vmem:[#allocation6 + $0xa4] ss:$8 sps:$4 sm:$0xff]   ;;  %v1943_v27 = vld [vmem:[#allocation6 + $0xa0] ss:$8 sps:$4 sm:$0xff]  }
  0x2f   :  { %556 = vmatprep.mubr.bf16.mxu1 %v1539_v19  ;;  %v1944_v28 = vld [vmem:[#allocation6 + $0xb4] ss:$8 sps:$4 sm:$0xff]   ;;  %v1946_v29 = vld [vmem:[#allocation6 + $0xb0] ss:$8 sps:$4 sm:$0xff]   ;;  %v1947_v30 = vld [vmem:[#allocation6 + $0xc4] ss:$8 sps:$4 sm:$0xff]  }
  0x30   :  { %449 = vmatpush1.bf16.msra.mxu0 %v1919_v5  ;;  %1668 = vmatpush1.bf16.msra.mxu1 %v1919_v5  ;;  %v1949_v31 = vld [vmem:[#allocation6 + $0xc0] ss:$8 sps:$4 sm:$0xff]   ;;  %v1950_v32 = vld [vmem:[#allocation6 + $0xd4] ss:$8 sps:$4 sm:$0xff]   ;;  %v1952_v33 = vld [vmem:[#allocation6 + $0xd0] ss:$8 sps:$4 sm:$0xff]  }
  0x31   :  { %450 = vmatprep.subr.bf16.mxu0 %v1920_v6  ;;  %1653 = vmatprep.subr.bf16.mxu1 %v1920_v6  ;;  %v1953_v34 = vld [vmem:[#allocation6 + $0xe4] ss:$8 sps:$4 sm:$0xff]   ;;  %v1955_v35 = vld [vmem:[#allocation6 + $0xe0] ss:$8 sps:$4 sm:$0xff]   ;;  %v1956_v36 = vld [vmem:[#allocation6 + $0xf4] ss:$8 sps:$4 sm:$0xff]  }
  0x32   :  { %v1958_v37 = vld [vmem:[#allocation6 + $0xf0] ss:$8 sps:$4 sm:$0xff]   ;;  %v2215_v46 = vld [vmem:[#allocation3 + $0x20] sm:$0xff]  ;;  %v2217_v47 = vld [vmem:[#allocation3 + $0x28] sm:$0xff] }
  0x33   :  { %v2199_v38 = vld [vmem:[#allocation3 + $0x10] sm:$0xff]  ;;  %v2201_v39 = vld [vmem:[#allocation3 + $0x18] sm:$0xff]  ;;  %v2219_v48 = vld [vmem:[#allocation3 + $0xa0] sm:$0xff]  ;;  %v1527_v52 = vcombine.high %v2215_v46, %v2217_v47  ;;  %v1526_v58 = vcombine.low %v2215_v46, %v2217_v47 }
  0x34   :  { %451 = vmatpush1.bf16.msra.mxu0 %v1922_v7  ;;  %1669 = vmatpush1.bf16.msra.mxu1 %v1922_v7  ;;  %v2203_v40 = vld [vmem:[#allocation3 + $0x90] sm:$0xff]  ;;  %v2205_v41 = vld [vmem:[#allocation3 + $0x98] sm:$0xff]  ;;  %v1525_v44 = vcombine.high %v2199_v38, %v2201_v39  ;;  %v2221_v49 = vld [vmem:[#allocation3 + $0xa8] sm:$0xff]  ;;  %v1524_v50 = vcombine.low %v2199_v38, %v2201_v39 }
  0x35   :  { %452 = vmatprep.subr.bf16.mxu0 %v1923_v8  ;;  %1654 = vmatprep.subr.bf16.mxu1 %v1923_v8  ;;  %v1541_v45 = vcombine.high %v2203_v40, %v2205_v41  ;;  %v1540_v51 = vcombine.low %v2203_v40, %v2205_v41  ;;  %v1543_v53 = vcombine.high %v2219_v48, %v2221_v49  ;;  %v2231_v54 = vld [vmem:[#allocation3 + $0x30] sm:$0xff]  ;;  %v2233_v55 = vld [vmem:[#allocation3 + $0x38] sm:$0xff]  ;;  %v2247_v62 = vld [vmem:[#allocation3 + $0x40] sm:$0xff] }
  0x36   :  { %v2235_v56 = vld [vmem:[#allocation3 + $0xb0] sm:$0xff]  ;;  %v2237_v57 = vld [vmem:[#allocation3 + $0xb8] sm:$0xff]  ;;  %v1542_v59 = vcombine.low %v2219_v48, %v2221_v49  ;;  %v1529_v60 = vcombine.high %v2231_v54, %v2233_v55  ;;  %v2249_v63 = vld [vmem:[#allocation3 + $0x48] sm:$0xff]  ;;  %v1528_v2 = vcombine.low %v2231_v54, %v2233_v55 }
  0x37   :  { %v1545_v61 = vcombine.high %v2235_v56, %v2237_v57  ;;  %v2251_v0 = vld [vmem:[#allocation3 + $0xc0] sm:$0xff]  ;;  %v2253_v1 = vld [vmem:[#allocation3 + $0xc8] sm:$0xff]  ;;  %v1544_v3 = vcombine.low %v2235_v56, %v2237_v57  ;;  %v1531_v4 = vcombine.high %v2247_v62, %v2249_v63  ;;  %v2263_v6 = vld [vmem:[#allocation3 + $0x50] sm:$0xff] }
  0x38   :  { %453 = vmatpush1.bf16.msra.mxu0 %v1925_v9  ;;  %1670 = vmatpush1.bf16.msra.mxu1 %v1925_v9  ;;  %v1547_v5 = vcombine.high %v2251_v0, %v2253_v1  ;;  %v2265_v7 = vld [vmem:[#allocation3 + $0x58] sm:$0xff]  ;;  %v2267_v8 = vld [vmem:[#allocation3 + $0xd0] sm:$0xff]  ;;  %v2281_v19 = vld [vmem:[#allocation3 + $0x68] sm:$0xff] }
  0x39   :  { %454 = vmatprep.subr.bf16.mxu0 %v1926_v10  ;;  %1655 = vmatprep.subr.bf16.mxu1 %v1926_v10  ;;  %v2269_v9 = vld [vmem:[#allocation3 + $0xd8] sm:$0xff]  ;;  %v1530_v10 = vcombine.low %v2247_v62, %v2249_v63 }
  0x3a   :  { %v1549_v15 = vcombine.high %v2267_v8, %v2269_v9 }
  0x3c   :  { %455 = vmatpush1.bf16.msra.mxu0 %v1928_v11  ;;  %1671 = vmatpush1.bf16.msra.mxu1 %v1928_v11  ;;  %v1546_v11 = vcombine.low %v2251_v0, %v2253_v1 }
  0x3d   :  { %456 = vmatprep.subr.bf16.mxu0 %v1929_v12  ;;  %1656 = vmatprep.subr.bf16.mxu1 %v1929_v12  ;;  %v1533_v12 = vcombine.high %v2263_v6, %v2265_v7 }
  0x40   :  { %457 = vmatpush1.bf16.msra.mxu0 %v1931_v18  ;;  %1672 = vmatpush1.bf16.msra.mxu1 %v1931_v18  ;;  %v2279_v18 = vld [vmem:[#allocation3 + $0x60] sm:$0xff] }
  0x41   :  { %458 = vmatprep.subr.bf16.mxu0 %v1932_v20  ;;  %1657 = vmatprep.subr.bf16.mxu1 %v1932_v20  ;;  %v2283_v20 = vld [vmem:[#allocation3 + $0xe0] sm:$0xff] }
  0x44   :  { %459 = vmatpush1.bf16.msra.mxu0 %v1934_v21  ;;  %1673 = vmatpush1.bf16.msra.mxu1 %v1934_v21  ;;  %v2285_v21 = vld [vmem:[#allocation3 + $0xe8] sm:$0xff] }
  0x45   :  { %460 = vmatprep.subr.bf16.mxu0 %v1935_v22  ;;  %1658 = vmatprep.subr.bf16.mxu1 %v1935_v22  ;;  %v1532_v22 = vcombine.low %v2263_v6, %v2265_v7 }
  0x48   :  { %461 = vmatpush1.bf16.msra.mxu0 %v1937_v23  ;;  %1674 = vmatpush1.bf16.msra.mxu1 %v1937_v23  ;;  %v1548_v23 = vcombine.low %v2267_v8, %v2269_v9 }
  0x49   :  { %462 = vmatprep.subr.bf16.mxu0 %v1938_v24  ;;  %1659 = vmatprep.subr.bf16.mxu1 %v1938_v24  ;;  %v1535_v24 = vcombine.high %v2279_v18, %v2281_v19 }
  0x4c   :  { %463 = vmatpush1.bf16.msra.mxu0 %v1940_v25  ;;  %1675 = vmatpush1.bf16.msra.mxu1 %v1940_v25  ;;  %v1551_v25 = vcombine.high %v2283_v20, %v2285_v21 }
  0x4d   :  { %464 = vmatprep.subr.bf16.mxu0 %v1941_v26  ;;  %1660 = vmatprep.subr.bf16.mxu1 %v1941_v26  ;;  %v2295_v26 = vld [vmem:[#allocation3 + $0x70] sm:$0xff] }
  0x50   :  { %465 = vmatpush1.bf16.msra.mxu0 %v1943_v27  ;;  %1676 = vmatpush1.bf16.msra.mxu1 %v1943_v27  ;;  %v2297_v27 = vld [vmem:[#allocation3 + $0x78] sm:$0xff] }
  0x51   :  { %466 = vmatprep.subr.bf16.mxu0 %v1944_v28  ;;  %1661 = vmatprep.subr.bf16.mxu1 %v1944_v28  ;;  %v2299_v28 = vld [vmem:[#allocation3 + $0xf0] sm:$0xff] }
  0x54   :  { %467 = vmatpush1.bf16.msra.mxu0 %v1946_v29  ;;  %1677 = vmatpush1.bf16.msra.mxu1 %v1946_v29  ;;  %v2301_v29 = vld [vmem:[#allocation3 + $0xf8] sm:$0xff] }
  0x55   :  { %468 = vmatprep.subr.bf16.mxu0 %v1947_v30  ;;  %1662 = vmatprep.subr.bf16.mxu1 %v1947_v30  ;;  %v1534_v30 = vcombine.low %v2279_v18, %v2281_v19 }
  0x58   :  { %469 = vmatpush1.bf16.msra.mxu0 %v1949_v31  ;;  %1678 = vmatpush1.bf16.msra.mxu1 %v1949_v31  ;;  %v1550_v31 = vcombine.low %v2283_v20, %v2285_v21 }
  0x59   :  { %470 = vmatprep.subr.bf16.mxu0 %v1950_v32  ;;  %1663 = vmatprep.subr.bf16.mxu1 %v1950_v32  ;;  %v1537_v32 = vcombine.high %v2295_v26, %v2297_v27 }
  0x5c   :  { %471 = vmatpush1.bf16.msra.mxu0 %v1952_v33  ;;  %1679 = vmatpush1.bf16.msra.mxu1 %v1952_v33  ;;  %v1553_v33 = vcombine.high %v2299_v28, %v2301_v29 }
  0x5d   :  { %472 = vmatprep.subr.bf16.mxu0 %v1953_v34  ;;  %1664 = vmatprep.subr.bf16.mxu1 %v1953_v34  ;;  %v1536_v34 = vcombine.low %v2295_v26, %v2297_v27 }
  0x60   :  { %473 = vmatpush1.bf16.msra.mxu0 %v1955_v35  ;;  %1680 = vmatpush1.bf16.msra.mxu1 %v1955_v35  ;;  %v1552_v35 = vcombine.low %v2299_v28, %v2301_v29 }
  0x61   :  { %474 = vmatprep.subr.bf16.mxu0 %v1956_v36  ;;  %1665 = vmatprep.subr.bf16.mxu1 %v1956_v36  ;;  %v114_v36 = vlaneseq }
  0x64   :  { %475 = vmatpush1.bf16.msra.mxu0 %v1958_v37  ;;  %1681 = vmatpush1.bf16.msra.mxu1 %v1958_v37  ;;  %v115_v37 = vshrl.u32 %v114_v36, 7  ;;  %v678_v36 = vunpack.c.h.bf16 %v2219_v48 }
  0x67   :  { %477 = vmatmul.mubr.bf16.vlgmr.msra.gmra.mrb[0].mxu0 %v1522_v42  ;;  %557 = vmatmul.mubr.bf16.vlgmr.msra.gmra.mrb[0].mxu1 %v1538_v43  ;;  %v639_v42 = vunpack.c.l.bf16 %v2189_v14  ;;  %v116_v43 = vsub.s32 0, %v115_v37 }
  0x68   :  { %486 = vmatprep.mubr.bf16.mxu0 %v1525_v44  ;;  %566 = vmatprep.mubr.bf16.mxu1 %v1541_v45  ;;  %v120_v44 = vsub.s32 1, %v115_v37  ;;  %v637_v45 = vunpack.c.l.bf16 %v2187_v13  ;;  %v647_v37 = vunpack.c.l.bf16 %v2217_v47 }
  0x6f   :  { %487 = vmatmul.mubr.bf16.gmra.mrb[4].mxu0 %v1524_v50  ;;  %567 = vmatmul.mubr.bf16.gmra.mrb[4].mxu1 %v1540_v51  ;;  %v112_v50 = vld [vmem:[%s3114_s3] sm:$0x3]  ;;  %v2326_v51 = vstv %s3111_s0  ;;  %s2131_s0 = smov [#allocation8]  }
  0x70   :  { %496 = vmatprep.mubr.bf16.mxu0 %v1527_v52  ;;  %576 = vmatprep.mubr.bf16.mxu1 %v1543_v53  ;;  %v669_v52 = vunpack.c.l.bf16 %v2193_v16  ;;  %v670_v53 = vunpack.c.h.bf16 %v2193_v16  ;;  %v2345_v16 = vmul.f32 %v2326_v51, %v639_v42  ;;  %v679_v42 = vunpack.c.l.bf16 %v2221_v49  ;;  %s1509_s3 = sshll.u32 %s2131_s0, 4  ;;  %s1510_s3 = int_to_ptr.vmem [resolvable:$true] %s1509_s3 }
  0x71   :  { %s2099_s20 = scalar_lea.vmem %s1510_s3, 4096  ;;  %p2104_p3 = scmp.lt.s32.totalorder %s1510_s3, %s1510_s3 }
  0x72   :  { %p2100_p2 = scmp.ne.s32.totalorder %s1510_s3, %s2099_s20  ;;  %p2105_p4 = scmp.lt.s32.totalorder %s2099_s20, %s2099_s20 }
  0x74   :  { %p2106_p5 = por %p2105_p4, %p2104_p3 }
  0x76   :  { %p2107_p6 = pnand %p2106_p5, %p2100_p2 }
  0x77   :  { %497 = vmatmul.mubr.bf16.gmra.mrb[8].mxu0 %v1526_v58  ;;  %577 = vmatmul.mubr.bf16.gmra.mrb[8].mxu1 %v1542_v59  ;;  %v638_v58 = vunpack.c.h.bf16 %v2187_v13  ;;  %v640_v59 = vunpack.c.h.bf16 %v2189_v14  ;;  %v2348_v13 = vmul.f32 %v2326_v51, %v669_v52  ;;  %v2351_v14 = vmul.f32 %v2326_v51, %v670_v53 }
  0x78   :  { %506 = vmatprep.mubr.bf16.mxu0 %v1529_v60  ;;  %586 = vmatprep.mubr.bf16.mxu1 %v1545_v61  ;;  %v671_v60 = vunpack.c.l.bf16 %v2195_v17  ;;  %v672_v61 = vunpack.c.h.bf16 %v2195_v17 }
  0x79   :  { %v2354_v17 = vmul.f32 %v2326_v51, %v638_v58  ;;  %v2415_v58 = vmul.f32 %v2326_v51, %v678_v36  ;;  %v685_v36 = vunpack.c.l.bf16 %v2251_v0 }
  0x7f   :  { %507 = vmatmul.mubr.bf16.gmra.mrb[12].mxu0 %v1528_v2  ;;  %587 = vmatmul.mubr.bf16.gmra.mrb[12].mxu1 %v1544_v3  ;;  %v641_v2 = vunpack.c.l.bf16 %v2199_v38  ;;  %v2335_v3 = vrot.slane %v112_v50, %v116_v43  ;;  %v649_v43 = vunpack.c.l.bf16 %v2231_v54 }
  0x80   :  { %516 = vmatprep.mubr.bf16.mxu0 %v1531_v4  ;;  %596 = vmatprep.mubr.bf16.mxu1 %v1547_v5  ;;  %v2337_v4 = vstv %s766_s15  ;;  %v2339_v5 = vrot.slane %v112_v50, %v120_v44 }
  0x87   :  { %517 = vmatmul.mubr.bf16.gmra.mrb[16].mxu0 %v1530_v10  ;;  %597 = vmatmul.mubr.bf16.gmra.mrb[16].mxu1 %v1546_v11  ;;  %v2342_v10 = vmul.f32 %v2326_v51, %v637_v45  ;;  %v2357_v11 = vmul.f32 %v2326_v51, %v640_v59  ;;  %v2418_v59 = vmul.f32 %v2326_v51, %v647_v37  ;;  %v655_v37 = vunpack.c.l.bf16 %v2249_v63 }
  0x88   :  { %526 = vmatprep.mubr.bf16.mxu0 %v1533_v12  ;;  %606 = vmatprep.mubr.bf16.mxu1 %v1549_v15  ;;  %v2360_v12 = vmul.f32 %v2326_v51, %v671_v60  ;;  %v2363_v15 = vmul.f32 %v2326_v51, %v672_v61  ;;  %v2421_v60 = vmul.f32 %v2326_v51, %v679_v42  ;;  %v656_v42 = vunpack.c.h.bf16 %v2249_v63 }
  0x8f   :  { %527 = vmatmul.mubr.bf16.gmra.mrb[20].mxu0 %v1532_v22  ;;  %607 = vmatmul.mubr.bf16.gmra.mrb[20].mxu1 %v1548_v23  ;;  %v642_v22 = vunpack.c.h.bf16 %v2199_v38  ;;  %v2367_v23 = vmul.f32 %v2326_v51, %v641_v2  ;;  %v677_v38 = vunpack.c.l.bf16 %v2219_v48 }
  0x90   :  { %536 = vmatprep.mubr.bf16.mxu0 %v1535_v24  ;;  %616 = vmatprep.mubr.bf16.mxu1 %v1551_v25  ;;  %v673_v24 = vunpack.c.l.bf16 %v2203_v40  ;;  %v643_v25 = vunpack.c.l.bf16 %v2201_v39 }
  0x91   :  { %v2412_v53 = vmul.f32 %v2326_v51, %v677_v38  ;;  %v654_v38 = vunpack.c.h.bf16 %v2247_v62 }
  0x92   :  { %v2388_v44 = vmul.f32 %v2326_v51, %v673_v24  ;;  %v650_v24 = vunpack.c.h.bf16 %v2231_v54  ;;  %v686_v54 = vunpack.c.h.bf16 %v2251_v0 }
  0x97   :  { %537 = vmatmul.mubr.bf16.gmra.mrb[24].mxu0 %v1534_v30  ;;  %617 = vmatmul.mubr.bf16.gmra.mrb[24].mxu1 %v1550_v31  ;;  %v644_v30 = vunpack.c.h.bf16 %v2201_v39  ;;  %v674_v31 = vunpack.c.h.bf16 %v2203_v40  ;;  %v648_v39 = vunpack.c.h.bf16 %v2217_v47  ;;  %v680_v40 = vunpack.c.h.bf16 %v2221_v49 }
  0x98   :  { %546 = vmatprep.mubr.bf16.mxu0 %v1537_v32  ;;  %626 = vmatprep.mubr.bf16.mxu1 %v1553_v33  ;;  %v675_v32 = vunpack.c.l.bf16 %v2205_v41  ;;  %v676_v33 = vunpack.c.h.bf16 %v2205_v41  ;;  %v2385_v41 = vmul.f32 %v2326_v51, %v642_v22  ;;  %v2430_v22 = vmul.f32 %v2326_v51, %v649_v43 }
  0x99   :  { %v2394_v48 = vmul.f32 %v2326_v51, %v644_v30  ;;  %v2397_v45 = vmul.f32 %v2326_v51, %v674_v31  ;;  %v2424_v61 = vmul.f32 %v2326_v51, %v648_v39  ;;  %v2427_v2 = vmul.f32 %v2326_v51, %v680_v40 }
  0x9a   :  { %v2400_v47 = vmul.f32 %v2326_v51, %v675_v32  ;;  %v2403_v49 = vmul.f32 %v2326_v51, %v676_v33  ;;  %v682_v30 = vunpack.c.h.bf16 %v2235_v56  ;;  %v651_v31 = vunpack.c.l.bf16 %v2233_v55 }
  0x9b   :  { %v683_v32 = vunpack.c.l.bf16 %v2237_v57  ;;  %v652_v33 = vunpack.c.h.bf16 %v2233_v55  ;;  %v688_v39 = vunpack.c.h.bf16 %v2253_v1  ;;  %v657_v55 = vunpack.c.l.bf16 %v2263_v6 }
  0x9c   :  { %v2458_v0 = vmul.f32 %v2326_v51, %v651_v31  ;;  %v2479_v31 = vmul.f32 %v2326_v51, %v686_v54  ;;  %v689_v54 = vunpack.c.l.bf16 %v2267_v8 }
  0x9d   :  { %v2461_v43 = vmul.f32 %v2326_v51, %v683_v32  ;;  %v2464_v63 = vmul.f32 %v2326_v51, %v652_v33  ;;  %v2482_v32 = vmul.f32 %v2326_v51, %v655_v37  ;;  %v659_v37 = vunpack.c.l.bf16 %v2265_v7 }
  0x9e   :  { %3143 = vst [vmem:[#allocation14_spill] sm:$0xff] %v2479_v31  ;;  %v690_v31 = vunpack.c.h.bf16 %v2267_v8  ;;  %v695_v8 = vunpack.c.l.bf16 %v2285_v21 }
  0x9f   :  { %547 = vmatmul.mubr.bf16.gmra.mrb[28].mxu0 %v1536_v34  ;;  %627 = vmatmul.mubr.bf16.gmra.mrb[28].mxu1 %v1552_v35  ;;  %v645_v34 = vunpack.c.l.bf16 %v2215_v46  ;;  %v646_v35 = vunpack.c.h.bf16 %v2215_v46  ;;  %v2391_v46 = vmul.f32 %v2326_v51, %v643_v25  ;;  %v681_v25 = vunpack.c.l.bf16 %v2235_v56  ;;  %3144 = vst [vmem:[#allocation15_spill] sm:$0xff] %v2482_v32 }
  0xa0   :  { %v687_v56 = vunpack.c.l.bf16 %v2253_v1  ;;  %v696_v32 = vunpack.c.h.bf16 %v2285_v21 }
  0xa1   :  { %v2406_v50 = vmul.f32 %v2326_v51, %v645_v34  ;;  %v2409_v52 = vmul.f32 %v2326_v51, %v646_v35  ;;  %v684_v34 = vunpack.c.h.bf16 %v2237_v57  ;;  %v653_v35 = vunpack.c.l.bf16 %v2247_v62 }
  0xa2   :  { %v2449_v57 = vmul.f32 %v2326_v51, %v650_v24  ;;  %v2452_v40 = vmul.f32 %v2326_v51, %v681_v25  ;;  %v2455_v62 = vmul.f32 %v2326_v51, %v682_v30  ;;  %v2473_v25 = vmul.f32 %v2326_v51, %v654_v38 }
  0xa3   :  { %v2467_v1 = vmul.f32 %v2326_v51, %v684_v34  ;;  %v2470_v24 = vmul.f32 %v2326_v51, %v653_v35  ;;  %v2476_v30 = vmul.f32 %v2326_v51, %v685_v36  ;;  %v2485_v33 = vmul.f32 %v2326_v51, %v687_v56 }
  0xa4   :  { %3141 = vst [vmem:[#allocation12_spill] sm:$0xff] %v2473_v25  ;;  %v2488_v34 = vmul.f32 %v2326_v51, %v656_v42  ;;  %v2491_v35 = vmul.f32 %v2326_v51, %v688_v39  ;;  %v2494_v38 = vmul.f32 %v2326_v51, %v657_v55  ;;  %v658_v36 = vunpack.c.h.bf16 %v2263_v6 }
  0xa5   :  { %3142 = vst [vmem:[#allocation13_spill] sm:$0xff] %v2476_v30  ;;  %3145 = vst [vmem:[#allocation16_spill] sm:$0xff] %v2485_v33  ;;  %v691_v56 = vunpack.c.l.bf16 %v2269_v9  ;;  %v660_v33 = vunpack.c.h.bf16 %v2265_v7  ;;  %v692_v42 = vunpack.c.h.bf16 %v2269_v9  ;;  %v661_v39 = vunpack.c.l.bf16 %v2279_v18 }
  0xa6   :  { %3146 = vst [vmem:[#allocation17_spill] sm:$0xff] %v2488_v34  ;;  %3147 = vst [vmem:[#allocation18_spill] sm:$0xff] %v2491_v35  ;;  %v662_v35 = vunpack.c.h.bf16 %v2279_v18  ;;  %v693_v55 = vunpack.c.l.bf16 %v2283_v20  ;;  %v694_v6 = vunpack.c.h.bf16 %v2283_v20  ;;  %v664_v34 = vunpack.c.h.bf16 %v2281_v19 }
  0xa7   :  { %3148 = vst [vmem:[#allocation19_spill] sm:$0xff] %v2494_v38  ;;  %v663_v38 = vunpack.c.l.bf16 %v2281_v19  ;;  %v665_v7 = vunpack.c.l.bf16 %v2295_v26  ;;  %v2513_v9 = vmul.f32 %v2326_v51, %v658_v36  ;;  %v2516_v30 = vmul.f32 %v2326_v51, %v689_v54 }
  0xa8   :  { %v2519_v18 = vmul.f32 %v2326_v51, %v690_v31  ;;  %v2522_v20 = vmul.f32 %v2326_v51, %v659_v37  ;;  %v2525_v25 = vmul.f32 %v2326_v51, %v691_v56  ;;  %v2528_v19 = vmul.f32 %v2326_v51, %v660_v33 }
  0xa9   :  { %v2531_v21 = vmul.f32 %v2326_v51, %v692_v42  ;;  %v2534_v36 = vmul.f32 %v2326_v51, %v661_v39  ;;  %v2537_v54 = vmul.f32 %v2326_v51, %v662_v35  ;;  %v2540_v31 = vmul.f32 %v2326_v51, %v693_v55 }
  0xaa   :  { %3149 = vst [vmem:[#allocation20_spill] sm:$0xff] %v2528_v19  ;;  %v2543_v37 = vmul.f32 %v2326_v51, %v694_v6  ;;  %v2546_v56 = vmul.f32 %v2326_v51, %v663_v38  ;;  %v2549_v42 = vmul.f32 %v2326_v51, %v695_v8  ;;  %v2552_v39 = vmul.f32 %v2326_v51, %v664_v34 }
  0xab   :  { %3150 = vst [vmem:[#allocation21_spill] sm:$0xff] %v2531_v21  ;;  %3151 = vst [vmem:[#allocation22_spill] sm:$0xff] %v2534_v36  ;;  %v2555_v35 = vmul.f32 %v2326_v51, %v696_v32  ;;  %v2558_v55 = vmul.f32 %v2326_v51, %v665_v7  ;;  %v697_v8 = vunpack.c.l.bf16 %v2299_v28 }
  0xac   :  { %3152 = vst [vmem:[#allocation23_spill] sm:$0xff] %v2537_v54  ;;  %3153 = vst [vmem:[#allocation24_spill] sm:$0xff] %v2540_v31  ;;  %v666_v31 = vunpack.c.h.bf16 %v2295_v26 }
  0xad   :  { %3154 = vst [vmem:[#allocation25_spill] sm:$0xff] %v2543_v37  ;;  %3155 = vst [vmem:[#allocation26_spill] sm:$0xff] %v2546_v56 }
  0xae   :  { %3156 = vst [vmem:[#allocation27_spill] sm:$0xff] %v2549_v42  ;;  %3157 = vst [vmem:[#allocation28_spill] sm:$0xff] %v2552_v39 }
  0xaf   :  { %3158 = vst [vmem:[#allocation29_spill] sm:$0xff] %v2555_v35  ;;  %3159 = vst [vmem:[#allocation30_spill] sm:$0xff] %v2558_v55  ;;  %v698_v35 = vunpack.c.h.bf16 %v2299_v28 }
 0x13a   :  { %v478_v33 = vpop.f32.mrb[0].mxu0  ;;  %v558_v19 = vpop.f32.mrb[0].mxu1 }
 0x13b   :  { %v479_v6 = vadd.f32 %v478_v33, %v2335_v3  ;;  %v559_v37 = vadd.f32 %v558_v19, %v2335_v3  ;;  %v480_v38 = vpop.f32.mrb[1].mxu0  ;;  %v560_v56 = vpop.f32.mrb[1].mxu1 }
 0x13c   :  { %v481_v42 = vadd.f32 %v480_v38, %v2339_v5  ;;  %v561_v34 = vadd.f32 %v560_v56, %v2339_v5  ;;  %v482_v39 = vpop.f32.mrb[2].mxu0  ;;  %v562_v32 = vpop.f32.mrb[2].mxu1 }
 0x13d   :  { %v768_v33 = vmul.f32 %v2337_v4, %v479_v6  ;;  %v800_v19 = vmul.f32 %v2337_v4, %v559_v37  ;;  %v483_v55 = vadd.f32 %v482_v39, %v2335_v3  ;;  %v484_v54 = vpop.f32.mrb[3].mxu0  ;;  %v563_v26 = vadd.f32 %v562_v32, %v2335_v3  ;;  %v564_v36 = vpop.f32.mrb[3].mxu1 }
 0x13e   :  { %v769_v38 = vmul.f32 %v2337_v4, %v481_v42  ;;  %v801_v56 = vmul.f32 %v2337_v4, %v561_v34  ;;  %v485_v21 = vadd.f32 %v484_v54, %v2339_v5  ;;  %v565_v28 = vadd.f32 %v564_v36, %v2339_v5 }
 0x13f   :  { %v770_v7 = vmul.f32 %v2337_v4, %v483_v55  ;;  %v802_v6 = vmul.f32 %v2337_v4, %v563_v26  ;;  %v2579_v37 = vadd.f32 %v800_v19, %v2348_v13  ;;  %v2582_v39 = vadd.f32 %v768_v33, %v2342_v10 }
 0x140   :  { %v771_v32 = vmul.f32 %v2337_v4, %v485_v21  ;;  %v803_v42 = vmul.f32 %v2337_v4, %v565_v28  ;;  %v2587_v34 = vadd.f32 %v801_v56, %v2351_v14  ;;  %v2590_v54 = vadd.f32 %v769_v38, %v2354_v17 }
 0x141   :  { %3160 = vst [vmem:[#allocation31_spill] sm:$0xff] %v2579_v37  ;;  %3161 = vst [vmem:[#allocation32_spill] sm:$0xff] %v2582_v39  ;;  %v2593_v36 = vadd.f32 %v770_v7, %v2345_v16  ;;  %v2596_v55 = vadd.f32 %v802_v6, %v2360_v12  ;;  %v928_v10 = vmul.f32 %v2579_v37, %v2579_v37 }
 0x142   :  { %3162 = vst [vmem:[#allocation33_spill] sm:$0xff] %v2587_v34  ;;  %3163 = vst [vmem:[#allocation34_spill] sm:$0xff] %v2590_v54  ;;  %v896_v13 = vmul.f32 %v2582_v39, %v2582_v39  ;;  %v2603_v21 = vadd.f32 %v771_v32, %v2357_v11  ;;  %v2606_v14 = vadd.f32 %v803_v42, %v2363_v15  ;;  %v488_v17 = vpop.f32.mrb[4].mxu0  ;;  %v568_v33 = vpop.f32.mrb[4].mxu1 }
 0x143   :  { %3164 = vst [vmem:[#allocation35_spill] sm:$0xff] %v2596_v55  ;;  %v929_v16 = vmul.f32 %v2587_v34, %v2587_v34  ;;  %v897_v12 = vmul.f32 %v2590_v54, %v2590_v54  ;;  %v489_v7 = vadd.f32 %v488_v17, %v2335_v3  ;;  %v490_v19 = vpop.f32.mrb[5].mxu0  ;;  %v569_v26 = vadd.f32 %v568_v33, %v2335_v3  ;;  %v570_v38 = vpop.f32.mrb[5].mxu1 }
 0x144   :  { %3165 = vst [vmem:[#allocation36_spill] sm:$0xff] %v2606_v14  ;;  %v2615_v11 = vmul.f32 %v2326_v51, %v666_v31  ;;  %v491_v56 = vadd.f32 %v490_v19, %v2339_v5  ;;  %v492_v28 = vpop.f32.mrb[6].mxu0  ;;  %v571_v6 = vadd.f32 %v570_v38, %v2339_v5  ;;  %v572_v32 = vpop.f32.mrb[6].mxu1 }
 0x145   :  { %v1008_v42 = vadd.f32 %v929_v16, %v928_v10  ;;  %v960_v39 = vadd.f32 %v897_v12, %v896_v13  ;;  %v772_v54 = vmul.f32 %v2337_v4, %v489_v7  ;;  %v804_v17 = vmul.f32 %v2337_v4, %v569_v26  ;;  %v494_v34 = vpop.f32.mrb[7].mxu0  ;;  %v574_v37 = vpop.f32.mrb[7].mxu1 }
 0x146   :  { %3166 = vst [vmem:[#allocation37_spill] sm:$0xff] %v2615_v11  ;;  %v493_v33 = vadd.f32 %v492_v28, %v2335_v3  ;;  %v573_v31 = vadd.f32 %v572_v32, %v2335_v3  ;;  %v773_v15 = vmul.f32 %v2337_v4, %v491_v56  ;;  %v805_v19 = vmul.f32 %v2337_v4, %v571_v6 }
 0x147   :  { %v495_v11 = vadd.f32 %v494_v34, %v2339_v5  ;;  %v575_v38 = vadd.f32 %v574_v37, %v2339_v5  ;;  %1009 = vadd.xlane.f32.xlu1 %v1008_v42  ;;  %v2629_v10 = vadd.f32 %v772_v54, %v2367_v23  ;;  %961 = vadd.xlane.f32.xlu0 %v960_v39 }
 0x148   :  { %v806_v13 = vmul.f32 %v2337_v4, %v573_v31  ;;  %v898_v16 = vmul.f32 %v2593_v36, %v2593_v36  ;;  %v2635_v12 = vmul.f32 %v2326_v51, %v697_v8  ;;  %v2638_v7 = vadd.f32 %v773_v15, %v2385_v41 }
 0x149   :  { %v807_v34 = vmul.f32 %v2337_v4, %v575_v38  ;;  %v930_v37 = vmul.f32 %v2596_v55, %v2596_v55  ;;  %v2644_v23 = vmul.f32 %v2326_v51, %v698_v35  ;;  %v2647_v54 = vadd.f32 %v804_v17, %v2388_v44 }
 0x14a   :  { %v774_v39 = vmul.f32 %v2337_v4, %v493_v33  ;;  %v899_v8 = vmul.f32 %v2603_v21, %v2603_v21  ;;  %v900_v41 = vmul.f32 %v2629_v10, %v2629_v10  ;;  %v2655_v26 = vadd.f32 %v805_v19, %v2397_v45  ;;  %v498_v35 = vpop.f32.mrb[8].mxu0  ;;  %v578_v28 = vpop.f32.mrb[8].mxu1 }
 0x14b   :  { %v775_v15 = vmul.f32 %v2337_v4, %v495_v11  ;;  %v2659_v56 = vadd.f32 %v806_v13, %v2400_v47  ;;  %v901_v44 = vmul.f32 %v2638_v7, %v2638_v7  ;;  %v499_v6 = vadd.f32 %v498_v35, %v2335_v3  ;;  %v500_v42 = vpop.f32.mrb[9].mxu0  ;;  %v580_v33 = vpop.f32.mrb[9].mxu1 }
 0x14c   :  { %v963_v32 = vadd.f32 %v899_v8, %v898_v16  ;;  %v579_v17 = vadd.f32 %v578_v28, %v2335_v3  ;;  %v931_v45 = vmul.f32 %v2606_v14, %v2606_v14  ;;  %v2668_v11 = vadd.f32 %v807_v34, %v2403_v49  ;;  %v502_v19 = vpop.f32.mrb[10].mxu0  ;;  %v582_v38 = vpop.f32.mrb[10].mxu1 }
 0x14d   :  { %v501_v47 = vadd.f32 %v500_v42, %v2339_v5  ;;  %v581_v31 = vadd.f32 %v580_v33, %v2339_v5  ;;  %v966_v13 = vadd.f32 %v901_v44, %v900_v41  ;;  %v776_v35 = vmul.f32 %v2337_v4, %v499_v6  ;;  %v504_v14 = vpop.f32.mrb[11].mxu0  ;;  %v584_v55 = vpop.f32.mrb[11].mxu1 }
 0x14e   :  { %964 = vadd.xlane.f32.xlu0 %v963_v32  ;;  %v808_v16 = vmul.f32 %v2337_v4, %v579_v17  ;;  %v503_v8 = vadd.f32 %v502_v19, %v2335_v3  ;;  %v583_v28 = vadd.f32 %v582_v38, %v2335_v3  ;;  %v505_v42 = vadd.f32 %v504_v14, %v2339_v5 }
 0x14f   :  { %v777_v49 = vmul.f32 %v2337_v4, %v501_v47  ;;  %v809_v34 = vmul.f32 %v2337_v4, %v581_v31  ;;  %v585_v33 = vadd.f32 %v584_v55, %v2339_v5  ;;  %967 = vadd.xlane.f32.xlu1 %v966_v13  ;;  %v2681_v41 = vadd.f32 %v774_v39, %v2391_v46 }
 0x150   :  { %v778_v44 = vmul.f32 %v2337_v4, %v503_v8  ;;  %v1011_v6 = vadd.f32 %v931_v45, %v930_v37  ;;  %v932_v32 = vmul.f32 %v2647_v54, %v2647_v54  ;;  %v2687_v17 = vadd.f32 %v775_v15, %v2394_v48 }
 0x151   :  { %v2690_v47 = vadd.f32 %v776_v35, %v2406_v50  ;;  %v2693_v14 = vadd.f32 %v808_v16, %v2412_v53  ;;  %v810_v55 = vmul.f32 %v2337_v4, %v583_v28  ;;  %v2697_v46 = vadd.f32 %v777_v49, %v2409_v52 }
 0x152   :  { %v2700_v39 = vadd.f32 %v809_v34, %v2415_v58  ;;  %1012 = vadd.xlane.f32.xlu0 %v1011_v6  ;;  %v933_v37 = vmul.f32 %v2655_v26, %v2655_v26  ;;  %v934_v48 = vmul.f32 %v2659_v56, %v2659_v56  ;;  %v2707_v50 = vadd.f32 %v778_v44, %v2418_v59  ;;  %v508_v45 = vpop.f32.mrb[12].mxu0  ;;  %v588_v58 = vpop.f32.mrb[12].mxu1 }
 0x153   :  { %v779_v53 = vmul.f32 %v2337_v4, %v505_v42  ;;  %v811_v15 = vmul.f32 %v2337_v4, %v585_v33  ;;  %v935_v52 = vmul.f32 %v2668_v11, %v2668_v11  ;;  %v509_v31 = vadd.f32 %v508_v45, %v2335_v3  ;;  %v510_v38 = vpop.f32.mrb[13].mxu0  ;;  %v590_v35 = vpop.f32.mrb[13].mxu1 }
 0x154   :  { %v1014_v19 = vadd.f32 %v933_v37, %v932_v32  ;;  %v589_v13 = vadd.f32 %v588_v58, %v2335_v3  ;;  %v902_v59 = vmul.f32 %v2681_v41, %v2681_v41  ;;  %v511_v8 = vadd.f32 %v510_v38, %v2339_v5  ;;  %v512_v49 = vpop.f32.mrb[14].mxu0  ;;  %v592_v34 = vpop.f32.mrb[14].mxu1 }
 0x155   :  { %v1017_v16 = vadd.f32 %v935_v52, %v934_v48  ;;  %v591_v28 = vadd.f32 %v590_v35, %v2339_v5  ;;  %v903_v42 = vmul.f32 %v2687_v17, %v2687_v17  ;;  %v780_v33 = vmul.f32 %v2337_v4, %v509_v31  ;;  %v514_v37 = vpop.f32.mrb[15].mxu0  ;;  %v594_v48 = vpop.f32.mrb[15].mxu1 }
 0x156   :  { %1015 = vadd.xlane.f32.xlu1 %v1014_v19  ;;  %v812_v44 = vmul.f32 %v2337_v4, %v589_v13  ;;  %v513_v6 = vadd.f32 %v512_v49, %v2335_v3  ;;  %v593_v32 = vadd.f32 %v592_v34, %v2335_v3  ;;  %v781_v45 = vmul.f32 %v2337_v4, %v511_v8 }
 0x157   :  { %1018 = vadd.xlane.f32.xlu0 %v1017_v16  ;;  %v813_v52 = vmul.f32 %v2337_v4, %v591_v28  ;;  %v515_v58 = vadd.f32 %v514_v37, %v2339_v5  ;;  %v595_v38 = vadd.f32 %v594_v48, %v2339_v5  ;;  %v2730_v31 = vadd.f32 %v810_v55, %v2421_v60 }
 0x158   :  { %v2733_v19 = vadd.f32 %v779_v53, %v2424_v61  ;;  %v2736_v13 = vadd.f32 %v811_v15, %v2427_v2  ;;  %v904_v35 = vmul.f32 %v2690_v47, %v2690_v47  ;;  %v2741_v16 = vadd.f32 %v780_v33, %v2430_v22 }
 0x159   :  { %v2744_v8 = vadd.f32 %v812_v44, %v2452_v40  ;;  %v782_v28 = vmul.f32 %v2337_v4, %v513_v6  ;;  %v814_v60 = vmul.f32 %v2337_v4, %v593_v32  ;;  %v2749_v55 = vadd.f32 %v781_v45, %v2449_v57 }
 0x15a   :  { %3167 = vst [vmem:[#allocation38_spill] sm:$0xff] %v2736_v13  ;;  %3168 = vst [vmem:[#allocation39_spill] sm:$0xff] %v2741_v16  ;;  %v2752_v61 = vadd.f32 %v813_v52, %v2455_v62  ;;  %v969_v2 = vadd.f32 %v903_v42, %v902_v59  ;;  %v905_v53 = vmul.f32 %v2697_v46, %v2697_v46  ;;  %v518_v40 = vpop.f32.mrb[16].mxu0  ;;  %v598_v57 = vpop.f32.mrb[16].mxu1 }
 0x15b   :  { %3169 = vst [vmem:[#allocation40_spill] sm:$0xff] %v2744_v8  ;;  %3170 = vst [vmem:[#allocation41_spill] sm:$0xff] %v2749_v55  ;;  %v783_v22 = vmul.f32 %v2337_v4, %v515_v58  ;;  %v815_v15 = vmul.f32 %v2337_v4, %v595_v38  ;;  %v936_v49 = vmul.f32 %v2693_v14, %v2693_v14  ;;  %v520_v44 = vpop.f32.mrb[17].mxu0  ;;  %v600_v6 = vpop.f32.mrb[17].mxu1 }
 0x15c   :  { %3171 = vst [vmem:[#allocation42_spill] sm:$0xff] %v2752_v61  ;;  %v937_v34 = vmul.f32 %v2700_v39, %v2700_v39  ;;  %970 = vadd.xlane.f32.xlu1 %v969_v2  ;;  %v972_v33 = vadd.f32 %v905_v53, %v904_v35  ;;  %v519_v62 = vadd.f32 %v518_v40, %v2335_v3  ;;  %v522_v52 = vpop.f32.mrb[18].mxu0  ;;  %v602_v58 = vpop.f32.mrb[18].mxu1 }
 0x15d   :  { %v938_v59 = vmul.f32 %v2730_v31, %v2730_v31  ;;  %v939_v42 = vmul.f32 %v2736_v13, %v2736_v13  ;;  %v521_v37 = vadd.f32 %v520_v44, %v2339_v5  ;;  %v599_v48 = vadd.f32 %v598_v57, %v2335_v3  ;;  %v524_v40 = vpop.f32.mrb[19].mxu0  ;;  %v604_v13 = vpop.f32.mrb[19].mxu1 }
 0x15e   :  { %v1020_v32 = vadd.f32 %v937_v34, %v936_v49  ;;  %v601_v45 = vadd.f32 %v600_v6, %v2339_v5  ;;  %973 = vadd.xlane.f32.xlu0 %v972_v33  ;;  %v784_v38 = vmul.f32 %v2337_v4, %v519_v62  ;;  %v523_v2 = vadd.f32 %v522_v52, %v2335_v3 }
 0x15f   :  { %v1023_v35 = vadd.f32 %v939_v42, %v938_v59  ;;  %v603_v53 = vadd.f32 %v602_v58, %v2335_v3  ;;  %v785_v49 = vmul.f32 %v2337_v4, %v521_v37  ;;  %v816_v34 = vmul.f32 %v2337_v4, %v599_v48 }
 0x160   :  { %v817_v57 = vmul.f32 %v2337_v4, %v601_v45  ;;  %v525_v44 = vadd.f32 %v524_v40, %v2339_v5  ;;  %v2778_v6 = vadd.f32 %v782_v28, %v2458_v0  ;;  %v2781_v33 = vadd.f32 %v814_v60, %v2461_v43  ;;  %1021 = vadd.xlane.f32.xlu1 %v1020_v32  ;;  %v3175_v28 = vld [vmem:[#allocation12_spill] sm:$0xff]  ;;  %v3177_v60 = vld [vmem:[#allocation13_spill] sm:$0xff] }
 0x161   :  { %v2784_v62 = vadd.f32 %v783_v22, %v2464_v63  ;;  %v605_v59 = vadd.f32 %v604_v13, %v2339_v5  ;;  %v2788_v42 = vadd.f32 %v815_v15, %v2467_v1  ;;  %v2791_v37 = vadd.f32 %v784_v38, %v2470_v24  ;;  %v3179_v22 = vld [vmem:[#allocation14_spill] sm:$0xff] }
 0x162   :  { %3172 = vst [vmem:[#allocation43_spill] sm:$0xff] %v2781_v33  ;;  %v786_v48 = vmul.f32 %v2337_v4, %v523_v2  ;;  %v818_v0 = vmul.f32 %v2337_v4, %v603_v53  ;;  %1024 = vadd.xlane.f32.xlu0 %v1023_v35  ;;  %v2796_v43 = vadd.f32 %v785_v49, %v3175_v28  ;;  %v528_v52 = vpop.f32.mrb[20].mxu0  ;;  %v608_v58 = vpop.f32.mrb[20].mxu1 }
 0x163   :  { %3173 = vst [vmem:[#allocation44_spill] sm:$0xff] %v2788_v42  ;;  %3174 = vst [vmem:[#allocation45_spill] sm:$0xff] %v2791_v37  ;;  %v2799_v63 = vadd.f32 %v816_v34, %v3177_v60  ;;  %v2802_v32 = vadd.f32 %v817_v57, %v3179_v22  ;;  %v906_v1 = vmul.f32 %v2707_v50, %v2707_v50  ;;  %v530_v40 = vpop.f32.mrb[21].mxu0  ;;  %v610_v49 = vpop.f32.mrb[21].mxu1 }
 0x164   :  { %3176 = vst [vmem:[#allocation12_spill] sm:$0xff] %v2796_v43  ;;  %v787_v24 = vmul.f32 %v2337_v4, %v525_v44  ;;  %v907_v13 = vmul.f32 %v2733_v19, %v2733_v19  ;;  %v908_v15 = vmul.f32 %v2741_v16, %v2741_v16  ;;  %v909_v45 = vmul.f32 %v2749_v55, %v2749_v55  ;;  %v532_v60 = vpop.f32.mrb[22].mxu0 }
 0x165   :  { %3178 = vst [vmem:[#allocation13_spill] sm:$0xff] %v2799_v63  ;;  %v819_v38 = vmul.f32 %v2337_v4, %v605_v59  ;;  %v529_v35 = vadd.f32 %v528_v52, %v2335_v3  ;;  %v940_v2 = vmul.f32 %v2744_v8, %v2744_v8  ;;  %v941_v53 = vmul.f32 %v2752_v61, %v2752_v61  ;;  %v612_v59 = vpop.f32.mrb[22].mxu1  ;;  %v534_v61 = vpop.f32.mrb[23].mxu0 }
 0x166   :  { %v975_v34 = vadd.f32 %v907_v13, %v906_v1  ;;  %v978_v57 = vadd.f32 %v909_v45, %v908_v15  ;;  %v942_v44 = vmul.f32 %v2781_v33, %v2781_v33  ;;  %v943_v28 = vmul.f32 %v2788_v42, %v2788_v42  ;;  %v614_v16 = vpop.f32.mrb[23].mxu1  ;;  %v3180_v42 = vld [vmem:[#allocation15_spill] sm:$0xff] }
 0x167   :  { %v788_v22 = vmul.f32 %v2337_v4, %v529_v35  ;;  %v1026_v52 = vadd.f32 %v941_v53, %v940_v2  ;;  %v531_v8 = vadd.f32 %v530_v40, %v2339_v5  ;;  %v609_v55 = vadd.f32 %v608_v58, %v2335_v3  ;;  %v3182_v53 = vld [vmem:[#allocation16_spill] sm:$0xff] }
 0x168   :  { %976 = vadd.xlane.f32.xlu1 %v975_v34  ;;  %979 = vadd.xlane.f32.xlu0 %v978_v57  ;;  %v1029_v1 = vadd.f32 %v943_v28, %v942_v44  ;;  %v611_v13 = vadd.f32 %v610_v49, %v2339_v5  ;;  %v533_v15 = vadd.f32 %v532_v60, %v2335_v3  ;;  %v3184_v34 = vld [vmem:[#allocation17_spill] sm:$0xff]  ;;  %v3186_v28 = vld [vmem:[#allocation18_spill] sm:$0xff] }
 0x169   :  { %v2830_v33 = vadd.f32 %v786_v48, %v3180_v42  ;;  %v789_v35 = vmul.f32 %v2337_v4, %v531_v8  ;;  %v820_v2 = vmul.f32 %v2337_v4, %v609_v55  ;;  %v613_v58 = vadd.f32 %v612_v59, %v2335_v3  ;;  %v3188_v42 = vld [vmem:[#allocation19_spill] sm:$0xff] }
 0x16a   :  { %v2836_v40 = vadd.f32 %v818_v0, %v3182_v53  ;;  %v2839_v57 = vadd.f32 %v787_v24, %v3184_v34  ;;  %v821_v49 = vmul.f32 %v2337_v4, %v611_v13  ;;  %v535_v44 = vadd.f32 %v534_v61, %v2339_v5  ;;  %v618_v59 = vpop.f32.mrb[24].mxu1 }
 0x16b   :  { %3181 = vst [vmem:[#allocation14_spill] sm:$0xff] %v2830_v33  ;;  %v2844_v60 = vadd.f32 %v819_v38, %v3186_v28  ;;  %v2847_v48 = vadd.f32 %v788_v22, %v3188_v42  ;;  %v615_v8 = vadd.f32 %v614_v16, %v2339_v5  ;;  %v910_v55 = vmul.f32 %v2778_v6, %v2778_v6  ;;  %v538_v38 = vpop.f32.mrb[24].mxu0 }
 0x16c   :  { %3183 = vst [vmem:[#allocation15_spill] sm:$0xff] %v2836_v40  ;;  %3185 = vst [vmem:[#allocation16_spill] sm:$0xff] %v2839_v57  ;;  %1027 = vadd.xlane.f32.xlu1 %v1026_v52  ;;  %1030 = vadd.xlane.f32.xlu0 %v1029_v1  ;;  %v2853_v0 = vadd.f32 %v789_v35, %v2513_v9  ;;  %v2856_v24 = vadd.f32 %v820_v2, %v2516_v30  ;;  %v540_v1 = vpop.f32.mrb[25].mxu0  ;;  %v620_v30 = vpop.f32.mrb[25].mxu1 }
 0x16d   :  { %3187 = vst [vmem:[#allocation17_spill] sm:$0xff] %v2844_v60  ;;  %3189 = vst [vmem:[#allocation18_spill] sm:$0xff] %v2847_v48  ;;  %v790_v61 = vmul.f32 %v2337_v4, %v533_v15  ;;  %v2861_v13 = vadd.f32 %v821_v49, %v2519_v18  ;;  %v822_v16 = vmul.f32 %v2337_v4, %v613_v58  ;;  %v542_v53 = vpop.f32.mrb[26].mxu0  ;;  %v622_v58 = vpop.f32.mrb[26].mxu1 }
 0x16e   :  { %3190 = vst [vmem:[#allocation19_spill] sm:$0xff] %v2853_v0  ;;  %3191 = vst [vmem:[#allocation46_spill] sm:$0xff] %v2856_v24  ;;  %v911_v52 = vmul.f32 %v2784_v62, %v2784_v62  ;;  %v912_v9 = vmul.f32 %v2791_v37, %v2791_v37  ;;  %v791_v35 = vmul.f32 %v2337_v4, %v535_v44  ;;  %v544_v44 = vpop.f32.mrb[27].mxu0  ;;  %v624_v22 = vpop.f32.mrb[27].mxu1 }
 0x16f   :  { %3192 = vst [vmem:[#allocation47_spill] sm:$0xff] %v2861_v13  ;;  %v913_v15 = vmul.f32 %v2796_v43, %v2796_v43  ;;  %v539_v2 = vadd.f32 %v538_v38, %v2335_v3  ;;  %v944_v18 = vmul.f32 %v2799_v63, %v2799_v63  ;;  %v823_v34 = vmul.f32 %v2337_v4, %v615_v8 }
 0x170   :  { %v981_v49 = vadd.f32 %v911_v52, %v910_v55  ;;  %v945_v28 = vmul.f32 %v2802_v32, %v2802_v32  ;;  %v946_v42 = vmul.f32 %v2836_v40, %v2836_v40  ;;  %v947_v38 = vmul.f32 %v2844_v60, %v2844_v60 }
 0x171   :  { %v984_v45 = vadd.f32 %v913_v15, %v912_v9  ;;  %v792_v43 = vmul.f32 %v2337_v4, %v539_v2  ;;  %v541_v63 = vadd.f32 %v540_v1, %v2339_v5  ;;  %v619_v8 = vadd.f32 %v618_v59, %v2335_v3 }
 0x172   :  { %982 = vadd.xlane.f32.xlu1 %v981_v49  ;;  %v1032_v37 = vadd.f32 %v945_v28, %v944_v18  ;;  %v621_v55 = vadd.f32 %v620_v30, %v2339_v5  ;;  %v543_v52 = vadd.f32 %v542_v53, %v2335_v3  ;;  %v2887_v40 = vadd.f32 %v790_v61, %v2522_v20  ;;  %v548_v61 = vpop.f32.mrb[28].mxu0  ;;  %v628_v53 = vpop.f32.mrb[28].mxu1  ;;  %v3196_v28 = vld [vmem:[#allocation22_spill] sm:$0xff] }
 0x173   :  { %985 = vadd.xlane.f32.xlu0 %v984_v45  ;;  %v1035_v9 = vadd.f32 %v947_v38, %v946_v42  ;;  %v793_v15 = vmul.f32 %v2337_v4, %v541_v63  ;;  %v623_v2 = vadd.f32 %v622_v58, %v2335_v3  ;;  %v2892_v60 = vadd.f32 %v822_v16, %v2525_v25  ;;  %v3193_v58 = vld [vmem:[#allocation20_spill] sm:$0xff]  ;;  %v3194_v16 = vld [vmem:[#allocation21_spill] sm:$0xff]  ;;  %v550_v38 = vpop.f32.mrb[29].mxu0 }
 0x174   :  { %v824_v1 = vmul.f32 %v2337_v4, %v619_v8  ;;  %v794_v59 = vmul.f32 %v2337_v4, %v543_v52  ;;  %v545_v30 = vadd.f32 %v544_v44, %v2339_v5  ;;  %v825_v18 = vmul.f32 %v2337_v4, %v621_v55  ;;  %v630_v8 = vpop.f32.mrb[29].mxu1 }
 0x175   :  { %v826_v20 = vmul.f32 %v2337_v4, %v623_v2  ;;  %v625_v45 = vadd.f32 %v624_v22, %v2339_v5  ;;  %v914_v63 = vmul.f32 %v2830_v33, %v2830_v33  ;;  %v2903_v25 = vadd.f32 %v791_v35, %v3193_v58  ;;  %v3197_v22 = vld [vmem:[#allocation23_spill] sm:$0xff]  ;;  %v552_v2 = vpop.f32.mrb[30].mxu0  ;;  %v3198_v58 = vld [vmem:[#allocation24_spill] sm:$0xff] }
 0x176   :  { %v2906_v49 = vadd.f32 %v823_v34, %v3194_v16  ;;  %v2909_v42 = vadd.f32 %v792_v43, %v3196_v28  ;;  %1033 = vadd.xlane.f32.xlu1 %v1032_v37  ;;  %v795_v44 = vmul.f32 %v2337_v4, %v545_v30  ;;  %v2913_v55 = vadd.f32 %v793_v15, %v3197_v22  ;;  %v632_v43 = vpop.f32.mrb[30].mxu1  ;;  %v3199_v28 = vld [vmem:[#allocation25_spill] sm:$0xff] }
 0x177   :  { %1036 = vadd.xlane.f32.xlu0 %v1035_v9  ;;  %v827_v52 = vmul.f32 %v2337_v4, %v625_v45  ;;  %v915_v35 = vmul.f32 %v2839_v57, %v2839_v57  ;;  %v916_v34 = vmul.f32 %v2847_v48, %v2847_v48  ;;  %v2921_v37 = vadd.f32 %v824_v1, %v3198_v58  ;;  %v554_v45 = vpop.f32.mrb[31].mxu0  ;;  %v634_v16 = vpop.f32.mrb[31].mxu1 }
 0x178   :  { %3195 = vst [vmem:[#allocation20_spill] sm:$0xff] %v2906_v49  ;;  %v917_v30 = vmul.f32 %v2853_v0, %v2853_v0  ;;  %v549_v9 = vadd.f32 %v548_v61, %v2335_v3  ;;  %v948_v15 = vmul.f32 %v2856_v24, %v2856_v24  ;;  %v2929_v22 = vadd.f32 %v825_v18, %v3199_v28  ;;  %v3200_v28 = vld [vmem:[#allocation27_spill] sm:$0xff] }
 0x179   :  { %v987_v57 = vadd.f32 %v915_v35, %v914_v63  ;;  %v949_v48 = vmul.f32 %v2861_v13, %v2861_v13  ;;  %v950_v1 = vmul.f32 %v2892_v60, %v2892_v60  ;;  %v951_v61 = vmul.f32 %v2906_v49, %v2906_v49 }
 0x17a   :  { %v990_v58 = vadd.f32 %v917_v30, %v916_v34  ;;  %v796_v0 = vmul.f32 %v2337_v4, %v549_v9  ;;  %v551_v24 = vadd.f32 %v550_v38, %v2339_v5  ;;  %v629_v18 = vadd.f32 %v628_v53, %v2335_v3  ;;  %v3201_v38 = vld [vmem:[#allocation29_spill] sm:$0xff] }
 0x17b   :  { %988 = vadd.xlane.f32.xlu1 %v987_v57  ;;  %v1038_v33 = vadd.f32 %v949_v48, %v948_v15  ;;  %v631_v63 = vadd.f32 %v630_v8, %v2339_v5  ;;  %v553_v35 = vadd.f32 %v552_v2, %v2335_v3  ;;  %v2943_v13 = vadd.f32 %v826_v20, %v3200_v28  ;;  %v3202_v15 = vld [vmem:[#allocation26_spill] sm:$0xff]  ;;  %v3207_v28 = vld [vmem:[#allocation28_spill] sm:$0xff] }
 0x17c   :  { %991 = vadd.xlane.f32.xlu0 %v990_v58  ;;  %v1041_v34 = vadd.f32 %v951_v61, %v950_v1  ;;  %v797_v30 = vmul.f32 %v2337_v4, %v551_v24  ;;  %v633_v9 = vadd.f32 %v632_v43, %v2335_v3  ;;  %v828_v49 = vmul.f32 %v2337_v4, %v629_v18  ;;  %v3205_v61 = vld [vmem:[#allocation30_spill] sm:$0xff] }
 0x17d   :  { %v829_v57 = vmul.f32 %v2337_v4, %v631_v63  ;;  %v798_v48 = vmul.f32 %v2337_v4, %v553_v35  ;;  %v555_v53 = vadd.f32 %v554_v45, %v2339_v5  ;;  %v2952_v8 = vadd.f32 %v827_v52, %v3201_v38 }
 0x17e   :  { %v830_v20 = vmul.f32 %v2337_v4, %v633_v9  ;;  %v635_v2 = vadd.f32 %v634_v16, %v2339_v5  ;;  %v918_v24 = vmul.f32 %v2887_v40, %v2887_v40  ;;  %v2959_v3 = vadd.f32 %v794_v59, %v3202_v15  ;;  %v3206_v16 = vld [vmem:[#allocation37_spill] sm:$0xff] }
 0x17f   :  { %1039 = vadd.xlane.f32.xlu1 %v1038_v33  ;;  %v3203_v43 = vunpack.c.l.bf16 %v2297_v27  ;;  %v3204_v45 = vunpack.c.h.bf16 %v2297_v27  ;;  %v799_v58 = vmul.f32 %v2337_v4, %v555_v53  ;;  %v2969_v18 = vadd.f32 %v796_v0, %v3205_v61 }
 0x180   :  { %1042 = vadd.xlane.f32.xlu0 %v1041_v34  ;;  %v831_v5 = vmul.f32 %v2337_v4, %v635_v2  ;;  %v919_v59 = vmul.f32 %v2903_v25, %v2903_v25  ;;  %v920_v33 = vmul.f32 %v2909_v42, %v2909_v42  ;;  %v2977_v63 = vadd.f32 %v797_v30, %v3206_v16 }
 0x181   :  { %v732_v1 = vmul.f32 %v2326_v51, %v3203_v43  ;;  %v733_v52 = vmul.f32 %v2326_v51, %v3204_v45  ;;  %v921_v27 = vmul.f32 %v2913_v55, %v2913_v55  ;;  %v952_v35 = vmul.f32 %v2921_v37, %v2921_v37 }
 0x182   :  { %v953_v0 = vmul.f32 %v2929_v22, %v2929_v22  ;;  %v2986_v4 = vadd.f32 %v795_v44, %v3207_v28  ;;  %v993_v34 = vadd.f32 %v919_v59, %v918_v24  ;;  %v954_v9 = vmul.f32 %v2943_v13, %v2943_v13 }
 0x183   :  { %v955_v30 = vmul.f32 %v2952_v8, %v2952_v8  ;;  %v996_v53 = vadd.f32 %v921_v27, %v920_v33  ;;  %v2993_v38 = vadd.f32 %v828_v49, %v2635_v12  ;;  %v2996_v2 = vadd.f32 %v829_v57, %v2644_v23 }
 0x184   :  { %v2998_v15 = vadd.f32 %v798_v48, %v732_v1  ;;  %994 = vadd.xlane.f32.xlu1 %v993_v34  ;;  %v1044_v43 = vadd.f32 %v953_v0, %v952_v35  ;;  %v3000_v44 = vadd.f32 %v799_v58, %v733_v52  ;;  %v924_v45 = vmul.f32 %v2969_v18, %v2969_v18 }
 0x185   :  { %997 = vadd.xlane.f32.xlu0 %v996_v53  ;;  %v1047_v24 = vadd.f32 %v955_v30, %v954_v9  ;;  %v925_v61 = vmul.f32 %v2977_v63, %v2977_v63  ;;  %v3208_v12 = vunpack.c.l.bf16 %v2301_v29  ;;  %v3209_v23 = vunpack.c.h.bf16 %v2301_v29 }
 0x186   :  { %v922_v48 = vmul.f32 %v2959_v3, %v2959_v3  ;;  %v923_v1 = vmul.f32 %v2986_v4, %v2986_v4  ;;  %v956_v52 = vmul.f32 %v2993_v38, %v2993_v38  ;;  %v957_v58 = vmul.f32 %v2996_v2, %v2996_v2 }
 0x187   :  { %v764_v49 = vmul.f32 %v2326_v51, %v3208_v12  ;;  %v765_v57 = vmul.f32 %v2326_v51, %v3209_v23  ;;  %v1002_v59 = vadd.f32 %v925_v61, %v924_v45  ;;  %v926_v29 = vmul.f32 %v2998_v15, %v2998_v15  ;;  %v3210_v61 = vld [vmem:[#allocation31_spill] sm:$0xff] }
 0x188   :  { %1045 = vadd.xlane.f32.xlu1 %v1044_v43  ;;  %v927_v51 = vmul.f32 %v3000_v44, %v3000_v44  ;;  %v999_v27 = vadd.f32 %v923_v1, %v922_v48  ;;  %v1050_v35 = vadd.f32 %v957_v58, %v956_v52  ;;  %v3213_v1 = vld [vmem:[#allocation34_spill] sm:$0xff] }
 0x189   :  { %1048 = vadd.xlane.f32.xlu0 %v1047_v24  ;;  %v3024_v33 = vadd.f32 %v830_v20, %v764_v49  ;;  %v3026_v16 = vadd.f32 %v831_v5, %v765_v57  ;;  %v3211_v49 = vld [vmem:[#allocation33_spill] sm:$0xff]  ;;  %v3212_v57 = vld [vmem:[#allocation32_spill] sm:$0xff] }
 0x18a   :  { %v1005_v0 = vadd.f32 %v927_v51, %v926_v29 }
 0x18b   :  { %v958_v28 = vmul.f32 %v3024_v33, %v3024_v33  ;;  %v959_v34 = vmul.f32 %v3026_v16, %v3026_v16 }
 0x18c   :  { %1000 = vadd.xlane.f32.xlu1 %v999_v27 }
 0x18d   :  { %1003 = vadd.xlane.f32.xlu0 %v1002_v59  ;;  %v1053_v9 = vadd.f32 %v959_v34, %v958_v28 }
 0x190   :  { %1051 = vadd.xlane.f32.xlu1 %v1050_v35 }
 0x191   :  { %1006 = vadd.xlane.f32.xlu0 %v1005_v0 }
 0x194   :  { %1054 = vadd.xlane.f32.xlu1 %v1053_v9 }
 0x1d4   :  { %v1010_v30 = vpop.xlane.xlu1 %1009  ;;  %v962_v20 = vpop.xlane.xlu0 %961 }
 0x1d5   :  { %1991 = vrsqrt.f32 %v1010_v30 }
 0x1d6   :  { %1993 = vrsqrt.f32 %v962_v20 }
 0x1db   :  { %v965_v5 = vpop.xlane.xlu0 %964 }
 0x1dc   :  { %1995 = vrsqrt.f32 %v965_v5  ;;  %v968_v53 = vpop.xlane.xlu1 %967 }
 0x1dd   :  { %1997 = vrsqrt.f32 %v968_v53 }
 0x1df   :  { %v1992_v43 = vpop.eup %1991  ;;  %v1013_v24 = vpop.xlane.xlu0 %1012 }
 0x1e0   :  { %v1994_v45 = vpop.eup %1993  ;;  %1999 = vrsqrt.f32 %v1013_v24  ;;  %v1120_v12 = vmul.f32 %v1992_v43, %v3210_v61  ;;  %v1121_v23 = vmul.f32 %v1992_v43, %v3211_v49  ;;  %v3214_v24 = vld [vmem:[#allocation35_spill] sm:$0xff]  ;;  %v3215_v61 = vld [vmem:[#allocation36_spill] sm:$0xff] }
 0x1e1   :  { %v1088_v48 = vmul.f32 %v1994_v45, %v3212_v57  ;;  %v1089_v52 = vmul.f32 %v1994_v45, %v3213_v1 }
 0x1e2   :  { %v1799_v58 = vpack.i.bf16 %v1121_v23, %v1120_v12 }
 0x1e3   :  { %v1016_v59 = vpop.xlane.xlu1 %1015  ;;  %v1687_v29 = vpack.i.bf16 %v1089_v52, %v1088_v48 }
 0x1e4   :  { %2001 = vrsqrt.f32 %v1016_v59  ;;  %v1019_v51 = vpop.xlane.xlu0 %1018  ;;  %1800 = vxpose.xlu1.b32.start [1/16] %v1799_v58, 128 }
 0x1e5   :  { %2003 = vrsqrt.f32 %v1019_v51  ;;  %1688 = vxpose.xlu0.b32.start [1/16] %v1687_v29, 128 }
 0x1e6   :  { %v1996_v27 = vpop.eup %1995 }
 0x1e7   :  { %v1998_v35 = vpop.eup %1997  ;;  %v1090_v0 = vmul.f32 %v1996_v27, %v2593_v36  ;;  %v1091_v28 = vmul.f32 %v1996_v27, %v2603_v21 }
 0x1e8   :  { %v1092_v34 = vmul.f32 %v1998_v35, %v2629_v10  ;;  %v1093_v9 = vmul.f32 %v1998_v35, %v2638_v7 }
 0x1e9   :  { %v971_v30 = vpop.xlane.xlu1 %970  ;;  %v1689_v20 = vpack.i.bf16 %v1091_v28, %v1090_v0 }
 0x1ea   :  { %v2000_v5 = vpop.eup %1999  ;;  %2005 = vrsqrt.f32 %v971_v30  ;;  %v1691_v43 = vpack.i.bf16 %v1093_v9, %v1092_v34 }
 0x1eb   :  { %v974_v53 = vpop.xlane.xlu0 %973  ;;  %1690 = vxpose.xlu0.b32.cont [2/16] %v1689_v20, 128  ;;  %v1122_v45 = vmul.f32 %v2000_v5, %v3214_v24  ;;  %v1123_v12 = vmul.f32 %v2000_v5, %v3215_v61 }
 0x1ec   :  { %2007 = vrsqrt.f32 %v974_v53  ;;  %v3216_v53 = vld [vmem:[#allocation38_spill] sm:$0xff] }
 0x1ed   :  { %v1022_v49 = vpop.xlane.xlu1 %1021  ;;  %v1801_v36 = vpack.i.bf16 %v1123_v12, %v1122_v45 }
 0x1ee   :  { %v2002_v23 = vpop.eup %2001  ;;  %2009 = vrsqrt.f32 %v1022_v49 }
 0x1ef   :  { %v2004_v21 = vpop.eup %2003  ;;  %v1025_v10 = vpop.xlane.xlu0 %1024  ;;  %1692 = vxpose.xlu0.b32.cont [3/16] %v1691_v43, 128  ;;  %1802 = vxpose.xlu1.b32.cont [2/16] %v1801_v36, 128  ;;  %v1124_v7 = vmul.f32 %v2002_v23, %v2647_v54  ;;  %v1125_v57 = vmul.f32 %v2002_v23, %v2655_v26  ;;  %v3217_v36 = vld [vmem:[#allocation39_spill] sm:$0xff] }
 0x1f0   :  { %2011 = vrsqrt.f32 %v1025_v10  ;;  %v1126_v1 = vmul.f32 %v2004_v21, %v2659_v56  ;;  %v1127_v52 = vmul.f32 %v2004_v21, %v2668_v11  ;;  %v3218_v21 = vld [vmem:[#allocation41_spill] sm:$0xff] }
 0x1f1   :  { %v1803_v48 = vpack.i.bf16 %v1125_v57, %v1124_v7 }
 0x1f2   :  { %v1805_v35 = vpack.i.bf16 %v1127_v52, %v1126_v1  ;;  %v3220_v52 = vld [vmem:[#allocation42_spill] sm:$0xff] }
 0x1f3   :  { %1804 = vxpose.xlu1.b32.cont [3/16] %v1803_v48, 128  ;;  %v3219_v48 = vld [vmem:[#allocation40_spill] sm:$0xff] }
 0x1f4   :  { %v2006_v58 = vpop.eup %2005 }
 0x1f5   :  { %v977_v59 = vpop.xlane.xlu1 %976  ;;  %v980_v29 = vpop.xlane.xlu0 %979  ;;  %v1094_v51 = vmul.f32 %v2006_v58, %v2681_v41  ;;  %v1095_v27 = vmul.f32 %v2006_v58, %v2687_v17 }
 0x1f6   :  { %2013 = vrsqrt.f32 %v977_v59  ;;  %v2008_v0 = vpop.eup %2007 }
 0x1f7   :  { %2015 = vrsqrt.f32 %v980_v29  ;;  %v1693_v54 = vpack.i.bf16 %v1095_v27, %v1094_v51  ;;  %1806 = vxpose.xlu1.b32.cont [4/16] %v1805_v35, 128  ;;  %v1096_v26 = vmul.f32 %v2008_v0, %v2690_v47  ;;  %v1097_v56 = vmul.f32 %v2008_v0, %v2697_v46  ;;  %v3221_v29 = vld [vmem:[#allocation43_spill] sm:$0xff]  ;;  %v3222_v27 = vld [vmem:[#allocation44_spill] sm:$0xff] }
 0x1f8   :  { %v2010_v28 = vpop.eup %2009 }
 0x1f9   :  { %v1028_v11 = vpop.xlane.xlu1 %1027  ;;  %v1031_v34 = vpop.xlane.xlu0 %1030  ;;  %1694 = vxpose.xlu0.b32.cont [4/16] %v1693_v54, 128  ;;  %v1128_v9 = vmul.f32 %v2010_v28, %v2693_v14  ;;  %v1129_v41 = vmul.f32 %v2010_v28, %v2700_v39  ;;  %v1695_v20 = vpack.i.bf16 %v1097_v56, %v1096_v26 }
 0x1fa   :  { %2017 = vrsqrt.f32 %v1028_v11  ;;  %v2012_v30 = vpop.eup %2011 }
 0x1fb   :  { %2019 = vrsqrt.f32 %v1031_v34  ;;  %v1807_v17 = vpack.i.bf16 %v1129_v41, %v1128_v9  ;;  %v1130_v5 = vmul.f32 %v2012_v30, %v2730_v31  ;;  %v1131_v43 = vmul.f32 %v2012_v30, %v3216_v53  ;;  %v3223_v30 = vld [vmem:[#allocation45_spill] sm:$0xff] }
 0x1fd   :  { %1808 = vxpose.xlu1.b32.cont [5/16] %v1807_v17, 128  ;;  %1696 = vxpose.xlu0.b32.cont [5/16] %v1695_v20, 128  ;;  %v1809_v45 = vpack.i.bf16 %v1131_v43, %v1130_v5  ;;  %v3224_v20 = vld [vmem:[#allocation12_spill] sm:$0xff] }
 0x1ff   :  { %v983_v47 = vpop.xlane.xlu1 %982 }
 0x200   :  { %2021 = vrsqrt.f32 %v983_v47  ;;  %v986_v46 = vpop.xlane.xlu0 %985  ;;  %v2014_v24 = vpop.eup %2013  ;;  %v3225_v47 = vld [vmem:[#allocation13_spill] sm:$0xff] }
 0x201   :  { %2023 = vrsqrt.f32 %v986_v46  ;;  %v2016_v61 = vpop.eup %2015  ;;  %v1098_v14 = vmul.f32 %v2014_v24, %v2707_v50  ;;  %v1099_v39 = vmul.f32 %v2014_v24, %v2733_v19  ;;  %1810 = vxpose.xlu1.b32.cont [6/16] %v1809_v45, 128 }
 0x202   :  { %v1100_v23 = vmul.f32 %v2016_v61, %v3217_v36  ;;  %v1101_v10 = vmul.f32 %v2016_v61, %v3218_v21  ;;  %v3226_v61 = vld [vmem:[#allocation15_spill] sm:$0xff] }
 0x203   :  { %v1034_v12 = vpop.xlane.xlu1 %1033  ;;  %v1697_v31 = vpack.i.bf16 %v1099_v39, %v1098_v14  ;;  %v3227_v39 = vld [vmem:[#allocation17_spill] sm:$0xff] }
 0x204   :  { %2025 = vrsqrt.f32 %v1034_v12  ;;  %v1037_v49 = vpop.xlane.xlu0 %1036  ;;  %v2018_v7 = vpop.eup %2017  ;;  %v1699_v19 = vpack.i.bf16 %v1101_v10, %v1100_v23  ;;  %v3228_v23 = vld [vmem:[#allocation14_spill] sm:$0xff]  ;;  %v3229_v10 = vld [vmem:[#allocation16_spill] sm:$0xff] }
 0x205   :  { %2027 = vrsqrt.f32 %v1037_v49  ;;  %v2020_v57 = vpop.eup %2019  ;;  %1698 = vxpose.xlu0.b32.cont [6/16] %v1697_v31, 128  ;;  %v1132_v1 = vmul.f32 %v2018_v7, %v3219_v48  ;;  %v1133_v58 = vmul.f32 %v2018_v7, %v3220_v52  ;;  %v3230_v48 = vld [vmem:[#allocation18_spill] sm:$0xff]  ;;  %v3231_v52 = vld [vmem:[#allocation19_spill] sm:$0xff] }
 0x206   :  { %v1134_v51 = vmul.f32 %v2020_v57, %v3221_v29  ;;  %v1135_v35 = vmul.f32 %v2020_v57, %v3222_v27 }
 0x207   :  { %v1811_v59 = vpack.i.bf16 %v1133_v58, %v1132_v1 }
 0x208   :  { %v989_v50 = vpop.xlane.xlu1 %988  ;;  %v1813_v34 = vpack.i.bf16 %v1135_v35, %v1134_v51  ;;  %v3232_v51 = vld [vmem:[#allocation46_spill] sm:$0xff]  ;;  %v3233_v35 = vld [vmem:[#allocation47_spill] sm:$0xff] }
 0x209   :  { %2029 = vrsqrt.f32 %v989_v50  ;;  %v992_v0 = vpop.xlane.xlu0 %991  ;;  %1812 = vxpose.xlu1.b32.cont [7/16] %v1811_v59, 128  ;;  %1700 = vxpose.xlu0.b32.cont [7/16] %v1699_v19, 128 }
 0x20a   :  { %v2022_v54 = vpop.eup %2021  ;;  %2031 = vrsqrt.f32 %v992_v0 }
 0x20b   :  { %v2024_v26 = vpop.eup %2023  ;;  %v1102_v56 = vmul.f32 %v2022_v54, %v2778_v6  ;;  %v1103_v28 = vmul.f32 %v2022_v54, %v2784_v62 }
 0x20c   :  { %v1040_v11 = vpop.xlane.xlu1 %1039  ;;  %v1104_v17 = vmul.f32 %v2024_v26, %v3223_v30  ;;  %v1105_v5 = vmul.f32 %v2024_v26, %v3224_v20 }
 0x20d   :  { %2033 = vrsqrt.f32 %v1040_v11  ;;  %v1043_v9 = vpop.xlane.xlu0 %1042  ;;  %v1701_v41 = vpack.i.bf16 %v1103_v28, %v1102_v56  ;;  %1814 = vxpose.xlu1.b32.cont [8/16] %v1813_v34, 128  ;;  %v3234_v34 = vld [vmem:[#allocation20_spill] sm:$0xff] }
 0x20e   :  { %v2026_v53 = vpop.eup %2025  ;;  %2035 = vrsqrt.f32 %v1043_v9  ;;  %v1703_v45 = vpack.i.bf16 %v1105_v5, %v1104_v17 }
 0x20f   :  { %v2028_v43 = vpop.eup %2027  ;;  %1702 = vxpose.xlu0.b32.cont [8/16] %v1701_v41, 128  ;;  %v1136_v46 = vmul.f32 %v2026_v53, %v3225_v47  ;;  %v1137_v6 = vmul.f32 %v2026_v53, %v2802_v32 }
 0x210   :  { %v1138_v14 = vmul.f32 %v2028_v43, %v3226_v61  ;;  %v1139_v12 = vmul.f32 %v2028_v43, %v3227_v39 }
 0x211   :  { %v995_v24 = vpop.xlane.xlu1 %994  ;;  %v1815_v62 = vpack.i.bf16 %v1137_v6, %v1136_v46 }
 0x212   :  { %2037 = vrsqrt.f32 %v995_v24  ;;  %v998_v49 = vpop.xlane.xlu0 %997  ;;  %v1817_v32 = vpack.i.bf16 %v1139_v12, %v1138_v14 }
 0x213   :  { %v2030_v31 = vpop.eup %2029  ;;  %2039 = vrsqrt.f32 %v998_v49  ;;  %1816 = vxpose.xlu1.b32.cont [9/16] %v1815_v62, 128  ;;  %1704 = vxpose.xlu0.b32.cont [9/16] %v1703_v45, 128 }
 0x214   :  { %v2032_v36 = vpop.eup %2031  ;;  %v1106_v21 = vmul.f32 %v2030_v31, %v3228_v23  ;;  %v1107_v7 = vmul.f32 %v2030_v31, %v3229_v10 }
 0x215   :  { %v1046_v57 = vpop.xlane.xlu1 %1045  ;;  %v1108_v1 = vmul.f32 %v2032_v36, %v3230_v48  ;;  %v1109_v58 = vmul.f32 %v2032_v36, %v3231_v52 }
 0x216   :  { %2041 = vrsqrt.f32 %v1046_v57  ;;  %v1049_v50 = vpop.xlane.xlu0 %1048  ;;  %v1705_v59 = vpack.i.bf16 %v1107_v7, %v1106_v21 }
 0x217   :  { %v2034_v19 = vpop.eup %2033  ;;  %2043 = vrsqrt.f32 %v1049_v50  ;;  %1818 = vxpose.xlu1.b32.cont [10/16] %v1817_v32, 128  ;;  %v1707_v26 = vpack.i.bf16 %v1109_v58, %v1108_v1 }
 0x218   :  { %v2036_v29 = vpop.eup %2035  ;;  %1706 = vxpose.xlu0.b32.cont [10/16] %v1705_v59, 128  ;;  %v1140_v27 = vmul.f32 %v2034_v19, %v3232_v51  ;;  %v1141_v0 = vmul.f32 %v2034_v19, %v3233_v35 }
 0x219   :  { %v1001_v54 = vpop.xlane.xlu1 %1000  ;;  %v1142_v11 = vmul.f32 %v2036_v29, %v2892_v60  ;;  %v1143_v9 = vmul.f32 %v2036_v29, %v3234_v34 }
 0x21a   :  { %2045 = vrsqrt.f32 %v1001_v54  ;;  %v1004_v56 = vpop.xlane.xlu0 %1003  ;;  %v1819_v28 = vpack.i.bf16 %v1141_v0, %v1140_v27 }
 0x21b   :  { %2047 = vrsqrt.f32 %v1004_v56  ;;  %v1821_v43 = vpack.i.bf16 %v1143_v9, %v1142_v11 }
 0x21c   :  { %v2038_v41 = vpop.eup %2037  ;;  %1820 = vxpose.xlu1.b32.cont [11/16] %v1819_v28, 128  ;;  %1708 = vxpose.xlu0.b32.cont [11/16] %v1707_v26, 128 }
 0x21d   :  { %v2040_v30 = vpop.eup %2039  ;;  %v1052_v17 = vpop.xlane.xlu1 %1051  ;;  %v1110_v20 = vmul.f32 %v2038_v41, %v2887_v40  ;;  %v1111_v5 = vmul.f32 %v2038_v41, %v2903_v25 }
 0x21e   :  { %2049 = vrsqrt.f32 %v1052_v17  ;;  %v1007_v53 = vpop.xlane.xlu0 %1006  ;;  %v1112_v46 = vmul.f32 %v2040_v30, %v2909_v42  ;;  %v1113_v60 = vmul.f32 %v2040_v30, %v2913_v55 }
 0x21f   :  { %2051 = vrsqrt.f32 %v1007_v53  ;;  %v1709_v47 = vpack.i.bf16 %v1111_v5, %v1110_v20 }
 0x220   :  { %v2042_v6 = vpop.eup %2041  ;;  %1822 = vxpose.xlu1.b32.cont [12/16] %v1821_v43, 128  ;;  %v1711_v61 = vpack.i.bf16 %v1113_v60, %v1112_v46 }
 0x221   :  { %v2044_v24 = vpop.eup %2043  ;;  %v1055_v62 = vpop.xlane.xlu1 %1054  ;;  %1710 = vxpose.xlu0.b32.cont [12/16] %v1709_v47, 128  ;;  %v1144_v45 = vmul.f32 %v2042_v6, %v2921_v37  ;;  %v1145_v40 = vmul.f32 %v2042_v6, %v2929_v22 }
 0x222   :  { %2053 = vrsqrt.f32 %v1055_v62  ;;  %v1146_v14 = vmul.f32 %v2044_v24, %v2943_v13  ;;  %v1147_v39 = vmul.f32 %v2044_v24, %v2952_v8 }
 0x223   :  { %v1823_v25 = vpack.i.bf16 %v1145_v40, %v1144_v45 }
 0x224   :  { %v2046_v12 = vpop.eup %2045  ;;  %v1825_v36 = vpack.i.bf16 %v1147_v39, %v1146_v14 }
 0x225   :  { %v2048_v42 = vpop.eup %2047  ;;  %1824 = vxpose.xlu1.b32.cont [13/16] %v1823_v25, 128  ;;  %1712 = vxpose.xlu0.b32.cont [13/16] %v1711_v61, 128  ;;  %v1114_v55 = vmul.f32 %v2046_v12, %v2959_v3  ;;  %v1115_v49 = vmul.f32 %v2046_v12, %v2986_v4 }
 0x226   :  { %v1116_v37 = vmul.f32 %v2048_v42, %v2969_v18  ;;  %v1117_v22 = vmul.f32 %v2048_v42, %v2977_v63 }
 0x227   :  { %v1713_v31 = vpack.i.bf16 %v1115_v49, %v1114_v55 }
 0x228   :  { %v2050_v23 = vpop.eup %2049  ;;  %v1715_v7 = vpack.i.bf16 %v1117_v22, %v1116_v37 }
 0x229   :  { %v2052_v21 = vpop.eup %2051  ;;  %1714 = vxpose.xlu0.b32.cont [14/16] %v1713_v31, 128  ;;  %1826 = vxpose.xlu1.b32.cont [14/16] %v1825_v36, 128  ;;  %v1148_v13 = vmul.f32 %v2050_v23, %v2993_v38  ;;  %v1149_v8 = vmul.f32 %v2050_v23, %v2996_v2 }
 0x22a   :  { %v1118_v3 = vmul.f32 %v2052_v21, %v2998_v15  ;;  %v1119_v4 = vmul.f32 %v2052_v21, %v3000_v44 }
 0x22b   :  { %v1827_v10 = vpack.i.bf16 %v1149_v8, %v1148_v13 }
 0x22c   :  { %v2054_v57 = vpop.eup %2053  ;;  %v1717_v48 = vpack.i.bf16 %v1119_v4, %v1118_v3 }
 0x22d   :  { %1828 = vxpose.xlu1.b32.cont [15/16] %v1827_v10, 128  ;;  %1716 = vxpose.xlu0.b32.cont [15/16] %v1715_v7, 128  ;;  %v1150_v18 = vmul.f32 %v2054_v57, %v3024_v33  ;;  %v1151_v63 = vmul.f32 %v2054_v57, %v3026_v16 }
 0x22f   :  { %v1829_v32 = vpack.i.bf16 %v1151_v63, %v1150_v18 }
 0x231   :  { %1830 = vxpose.xlu1.b32.end [16/16] %v1829_v32, 128  ;;  %1718 = vxpose.xlu0.b32.end [16/16] %v1717_v48, 128 }
 0x275   :  { %v1831_v38 = vpop.trf.xlu1  ;;  %v1719_v1 = vpop.trf.xlu0 }
 0x276   :  { %v1835_v2 = vunpack.i.h.bf16 %v1831_v38  ;;  %v1832_v52 = vunpack.i.l.bf16 %v1831_v38  ;;  %v1723_v58 = vunpack.i.h.bf16 %v1719_v1  ;;  %v1720_v50 = vunpack.i.l.bf16 %v1719_v1 }
 0x278   :  { %v1634_v15 = vpack.c.bf16 %v1835_v2, %v1723_v58  ;;  %v1618_v59 = vpack.c.bf16 %v1832_v52, %v1720_v50 }
 0x279   :  { %v1836_v44 = vpop.trf.xlu1  ;;  %v1724_v19 = vpop.trf.xlu0 }
 0x27a   :  { %v1840_v29 = vunpack.i.h.bf16 %v1836_v44  ;;  %v1837_v51 = vunpack.i.l.bf16 %v1836_v44  ;;  %1488 = vst [vmem:[#allocation8 + $0x80] sm:$0xff] %v1634_v15  ;;  %1472 = vst [vmem:[#allocation8] sm:$0xff] %v1618_v59  ;;  %v1728_v33 = vunpack.i.h.bf16 %v1724_v19  ;;  %v1725_v16 = vunpack.i.l.bf16 %v1724_v19 }
 0x27c   :  { %v1635_v27 = vpack.c.bf16 %v1840_v29, %v1728_v33  ;;  %v1619_v35 = vpack.c.bf16 %v1837_v51, %v1725_v16 }
 0x27d   :  { %v1841_v0 = vpop.trf.xlu1  ;;  %v1729_v54 = vpop.trf.xlu0 }
 0x27e   :  { %v1845_v26 = vunpack.i.h.bf16 %v1841_v0  ;;  %v1842_v56 = vunpack.i.l.bf16 %v1841_v0  ;;  %1489 = vst [vmem:[#allocation8 + $0x88] sm:$0xff] %v1635_v27  ;;  %1473 = vst [vmem:[#allocation8 + $0x8] sm:$0xff] %v1619_v35  ;;  %v1733_v28 = vunpack.i.h.bf16 %v1729_v54  ;;  %v1730_v11 = vunpack.i.l.bf16 %v1729_v54 }
 0x280   :  { %v1636_v34 = vpack.c.bf16 %v1845_v26, %v1733_v28  ;;  %v1620_v9 = vpack.c.bf16 %v1842_v56, %v1730_v11 }
 0x281   :  { %v1846_v41 = vpop.trf.xlu1  ;;  %v1734_v30 = vpop.trf.xlu0 }
 0x282   :  { %v1850_v17 = vunpack.i.h.bf16 %v1846_v41  ;;  %v1847_v20 = vunpack.i.l.bf16 %v1846_v41  ;;  %1490 = vst [vmem:[#allocation8 + $0x90] sm:$0xff] %v1636_v34  ;;  %1474 = vst [vmem:[#allocation8 + $0x10] sm:$0xff] %v1620_v9  ;;  %v1738_v5 = vunpack.i.h.bf16 %v1734_v30  ;;  %v1735_v53 = vunpack.i.l.bf16 %v1734_v30 }
 0x284   :  { %v1637_v43 = vpack.c.bf16 %v1850_v17, %v1738_v5  ;;  %v1621_v47 = vpack.c.bf16 %v1847_v20, %v1735_v53 }
 0x285   :  { %v1851_v46 = vpop.trf.xlu1  ;;  %v1739_v60 = vpop.trf.xlu0 }
 0x286   :  { %v1855_v6 = vunpack.i.h.bf16 %v1851_v46  ;;  %v1852_v24 = vunpack.i.l.bf16 %v1851_v46  ;;  %1491 = vst [vmem:[#allocation8 + $0x98] sm:$0xff] %v1637_v43  ;;  %1475 = vst [vmem:[#allocation8 + $0x18] sm:$0xff] %v1621_v47  ;;  %v1743_v62 = vunpack.i.h.bf16 %v1739_v60  ;;  %v1740_v45 = vunpack.i.l.bf16 %v1739_v60 }
 0x288   :  { %v1638_v40 = vpack.c.bf16 %v1855_v6, %v1743_v62  ;;  %v1622_v25 = vpack.c.bf16 %v1852_v24, %v1740_v45 }
 0x289   :  { %v1856_v61 = vpop.trf.xlu1  ;;  %v1744_v14 = vpop.trf.xlu0 }
 0x28a   :  { %v1860_v39 = vunpack.i.h.bf16 %v1856_v61  ;;  %v1857_v12 = vunpack.i.l.bf16 %v1856_v61  ;;  %1492 = vst [vmem:[#allocation8 + $0xa0] sm:$0xff] %v1638_v40  ;;  %1476 = vst [vmem:[#allocation8 + $0x20] sm:$0xff] %v1622_v25  ;;  %v1748_v42 = vunpack.i.h.bf16 %v1744_v14  ;;  %v1745_v55 = vunpack.i.l.bf16 %v1744_v14 }
 0x28c   :  { %v1639_v49 = vpack.c.bf16 %v1860_v39, %v1748_v42  ;;  %v1623_v31 = vpack.c.bf16 %v1857_v12, %v1745_v55 }
 0x28d   :  { %v1861_v36 = vpop.trf.xlu1  ;;  %v1749_v37 = vpop.trf.xlu0 }
 0x28e   :  { %v1865_v22 = vunpack.i.h.bf16 %v1861_v36  ;;  %v1862_v23 = vunpack.i.l.bf16 %v1861_v36  ;;  %1493 = vst [vmem:[#allocation8 + $0xa8] sm:$0xff] %v1639_v49  ;;  %1477 = vst [vmem:[#allocation8 + $0x28] sm:$0xff] %v1623_v31  ;;  %v1753_v21 = vunpack.i.h.bf16 %v1749_v37  ;;  %v1750_v13 = vunpack.i.l.bf16 %v1749_v37 }
 0x290   :  { %v1640_v8 = vpack.c.bf16 %v1865_v22, %v1753_v21  ;;  %v1624_v10 = vpack.c.bf16 %v1862_v23, %v1750_v13 }
 0x291   :  { %v1866_v7 = vpop.trf.xlu1  ;;  %v1754_v3 = vpop.trf.xlu0 }
 0x292   :  { %v1870_v4 = vunpack.i.h.bf16 %v1866_v7  ;;  %v1867_v57 = vunpack.i.l.bf16 %v1866_v7  ;;  %1494 = vst [vmem:[#allocation8 + $0xb0] sm:$0xff] %v1640_v8  ;;  %1478 = vst [vmem:[#allocation8 + $0x30] sm:$0xff] %v1624_v10  ;;  %v1758_v18 = vunpack.i.h.bf16 %v1754_v3  ;;  %v1755_v63 = vunpack.i.l.bf16 %v1754_v3 }
 0x294   :  { %v1641_v32 = vpack.c.bf16 %v1870_v4, %v1758_v18  ;;  %v1625_v48 = vpack.c.bf16 %v1867_v57, %v1755_v63 }
 0x295   :  { %v1871_v38 = vpop.trf.xlu1  ;;  %v1759_v1 = vpop.trf.xlu0 }
 0x296   :  { %v1875_v2 = vunpack.i.h.bf16 %v1871_v38  ;;  %v1872_v52 = vunpack.i.l.bf16 %v1871_v38  ;;  %1495 = vst [vmem:[#allocation8 + $0xb8] sm:$0xff] %v1641_v32  ;;  %1479 = vst [vmem:[#allocation8 + $0x38] sm:$0xff] %v1625_v48  ;;  %v1763_v58 = vunpack.i.h.bf16 %v1759_v1  ;;  %v1760_v50 = vunpack.i.l.bf16 %v1759_v1 }
 0x298   :  { %v1642_v15 = vpack.c.bf16 %v1875_v2, %v1763_v58  ;;  %v1626_v59 = vpack.c.bf16 %v1872_v52, %v1760_v50 }
 0x299   :  { %v1876_v44 = vpop.trf.xlu1  ;;  %v1764_v19 = vpop.trf.xlu0 }
 0x29a   :  { %v1880_v29 = vunpack.i.h.bf16 %v1876_v44  ;;  %v1877_v51 = vunpack.i.l.bf16 %v1876_v44  ;;  %1496 = vst [vmem:[#allocation8 + $0xc0] sm:$0xff] %v1642_v15  ;;  %1480 = vst [vmem:[#allocation8 + $0x40] sm:$0xff] %v1626_v59  ;;  %v1768_v33 = vunpack.i.h.bf16 %v1764_v19  ;;  %v1765_v16 = vunpack.i.l.bf16 %v1764_v19 }
 0x29c   :  { %v1643_v27 = vpack.c.bf16 %v1880_v29, %v1768_v33  ;;  %v1627_v35 = vpack.c.bf16 %v1877_v51, %v1765_v16 }
 0x29d   :  { %v1881_v0 = vpop.trf.xlu1  ;;  %v1769_v54 = vpop.trf.xlu0 }
 0x29e   :  { %v1885_v26 = vunpack.i.h.bf16 %v1881_v0  ;;  %v1882_v56 = vunpack.i.l.bf16 %v1881_v0  ;;  %1497 = vst [vmem:[#allocation8 + $0xc8] sm:$0xff] %v1643_v27  ;;  %1481 = vst [vmem:[#allocation8 + $0x48] sm:$0xff] %v1627_v35  ;;  %v1773_v28 = vunpack.i.h.bf16 %v1769_v54  ;;  %v1770_v11 = vunpack.i.l.bf16 %v1769_v54 }
 0x2a0   :  { %v1644_v34 = vpack.c.bf16 %v1885_v26, %v1773_v28  ;;  %v1628_v9 = vpack.c.bf16 %v1882_v56, %v1770_v11 }
 0x2a1   :  { %v1886_v41 = vpop.trf.xlu1  ;;  %v1774_v30 = vpop.trf.xlu0 }
 0x2a2   :  { %v1890_v17 = vunpack.i.h.bf16 %v1886_v41  ;;  %v1887_v20 = vunpack.i.l.bf16 %v1886_v41  ;;  %1498 = vst [vmem:[#allocation8 + $0xd0] sm:$0xff] %v1644_v34  ;;  %1482 = vst [vmem:[#allocation8 + $0x50] sm:$0xff] %v1628_v9  ;;  %v1778_v5 = vunpack.i.h.bf16 %v1774_v30  ;;  %v1775_v53 = vunpack.i.l.bf16 %v1774_v30 }
 0x2a4   :  { %v1645_v43 = vpack.c.bf16 %v1890_v17, %v1778_v5  ;;  %v1629_v47 = vpack.c.bf16 %v1887_v20, %v1775_v53 }
 0x2a5   :  { %v1891_v46 = vpop.trf.xlu1  ;;  %v1779_v60 = vpop.trf.xlu0 }
 0x2a6   :  { %v1895_v6 = vunpack.i.h.bf16 %v1891_v46  ;;  %v1892_v24 = vunpack.i.l.bf16 %v1891_v46  ;;  %1499 = vst [vmem:[#allocation8 + $0xd8] sm:$0xff] %v1645_v43  ;;  %1483 = vst [vmem:[#allocation8 + $0x58] sm:$0xff] %v1629_v47  ;;  %v1783_v62 = vunpack.i.h.bf16 %v1779_v60  ;;  %v1780_v45 = vunpack.i.l.bf16 %v1779_v60 }
 0x2a8   :  { %v1646_v40 = vpack.c.bf16 %v1895_v6, %v1783_v62  ;;  %v1630_v25 = vpack.c.bf16 %v1892_v24, %v1780_v45 }
 0x2a9   :  { %v1896_v61 = vpop.trf.xlu1  ;;  %v1784_v14 = vpop.trf.xlu0 }
 0x2aa   :  { %v1900_v39 = vunpack.i.h.bf16 %v1896_v61  ;;  %v1897_v12 = vunpack.i.l.bf16 %v1896_v61  ;;  %1500 = vst [vmem:[#allocation8 + $0xe0] sm:$0xff] %v1646_v40  ;;  %1484 = vst [vmem:[#allocation8 + $0x60] sm:$0xff] %v1630_v25  ;;  %v1788_v42 = vunpack.i.h.bf16 %v1784_v14  ;;  %v1785_v55 = vunpack.i.l.bf16 %v1784_v14 }
 0x2ac   :  { %v1647_v49 = vpack.c.bf16 %v1900_v39, %v1788_v42  ;;  %v1631_v31 = vpack.c.bf16 %v1897_v12, %v1785_v55 }
 0x2ad   :  { %v1901_v36 = vpop.trf.xlu1  ;;  %v1789_v37 = vpop.trf.xlu0 }
 0x2ae   :  { %v1905_v22 = vunpack.i.h.bf16 %v1901_v36  ;;  %v1902_v23 = vunpack.i.l.bf16 %v1901_v36  ;;  %1501 = vst [vmem:[#allocation8 + $0xe8] sm:$0xff] %v1647_v49  ;;  %1485 = vst [vmem:[#allocation8 + $0x68] sm:$0xff] %v1631_v31  ;;  %v1793_v21 = vunpack.i.h.bf16 %v1789_v37  ;;  %v1790_v13 = vunpack.i.l.bf16 %v1789_v37 }
 0x2b0   :  { %v1648_v8 = vpack.c.bf16 %v1905_v22, %v1793_v21  ;;  %v1632_v10 = vpack.c.bf16 %v1902_v23, %v1790_v13 }
 0x2b1   :  { %v1906_v7 = vpop.trf.xlu1  ;;  %v1794_v3 = vpop.trf.xlu0 }
 0x2b2   :  { %v1910_v4 = vunpack.i.h.bf16 %v1906_v7  ;;  %v1907_v57 = vunpack.i.l.bf16 %v1906_v7  ;;  %1502 = vst [vmem:[#allocation8 + $0xf0] sm:$0xff] %v1648_v8  ;;  %1486 = vst [vmem:[#allocation8 + $0x70] sm:$0xff] %v1632_v10  ;;  %v1798_v18 = vunpack.i.h.bf16 %v1794_v3  ;;  %v1795_v63 = vunpack.i.l.bf16 %v1794_v3 }
 0x2b4   :  { %v1649_v32 = vpack.c.bf16 %v1910_v4, %v1798_v18  ;;  %v1633_v48 = vpack.c.bf16 %v1907_v57, %v1795_v63 }
 0x2b6   :  { %1503 = vst [vmem:[#allocation8 + $0xf8] sm:$0xff] %v1649_v32  ;;  %1487 = vst [vmem:[#allocation8 + $0x78] sm:$0xff] %v1633_v48 }
 0x2b7   :  { %2110 = shalt.err (!%p2107_p6)
}
 0x2b8   :  { %s2111_s23 = scalar_lea.hbm %s3115_s4, 4096 }
 0x2b9   :  { %p2112_p7 = scmp.ne.s32.totalorder %s3115_s4, %s2111_s23  ;;  %p2115_p8 = scmp.lt.u32.totalorder %s2111_s23, %s3115_s4 }
 0x2bb   :  { %p2117_p9 = pnand %p2115_p8, %p2112_p7 }
 0x2bd   :  { %2120 = shalt.err (!%p2117_p9)
}
 0x2be   :  { %1515 = dma.vmem_to_hbm [thread:$0]  %s1510_s3, 4096, %s3115_s4, [#allocation5], %s2128_s25, %s2128_s25, %s2129_s26  }
 0x2bf   :  { %2125 = dma.done.wait [#allocation5], 4096  }
 0x2c0   :  { %2126 = vsyncadd [#allocation5], 4294963200 }
 0x2c1   :  { %1519 = vsyncpa [#allocation4], 1 }
 0x2c2   :  { %1520 = vsyncpa [#allocation7], 1 }
 0x2c3   :  { %1521 = vsyncpa [#allocation5], 1 }

</bundles_post_ra>
